<compile_context>
chip_gen: v7x
topology: tpu7x:2x2x1
jax: 0.10.0
libtpu: 0.0.40
codegen_flags: <defaults>
</compile_context>

<pallas_src>
import functools

import jax
import jax.numpy as jnp
from jax.experimental import pallas as pl
from jax.experimental.pallas import tpu as pltpu


_NEG_INF = -9e15            # same masking constant as the pyGAT reference
_VMEM_LIMIT = 48 << 20      # conservative: leaves headroom on v7x (64 MiB physical)


def _pick_row_tile(n):
    """Largest 'nice' query-row tile (multiple of 8) dividing n, else whole graph."""
    for t in (256, 128, 64, 32, 16, 8):
        if n % t == 0 and n // t >= 2:
            return t
    return n


# ----------------------------------------------------------------------------
# Fused multi-head GraphAttentionLayer kernel (one tile of query rows).
#   Wh    = x @ W_all                        (all heads, one wide MXU matmul)
#   e_h   = leaky_relu(f1_h + f2_h^T) + bias (f1/f2 = VPU reductions against a)
#   att_h = softmax(e_h, axis=1)             (approx-reciprocal normalization)
#   out_h = elu(att_h @ Wh_h)
#   final layer (concat=False, fused with GAT.forward tail) additionally
#   applies log_softmax over the class axis.
# ----------------------------------------------------------------------------
def _gat_layer_kernel(x_ref, bias_ref, w_ref, a1_ref, a2_ref, out_ref, wh_ref,
                      *, alpha, nheads, nhid, final):
    T = out_ref.shape[0]
    i0 = pl.multiple_of(pl.program_id(0) * T, T)   # first query row of this tile

    # (1) Wh for ALL nodes and ALL heads: one wide bf16 matmul, f32 accumulate.
    #     (Recomputed per row tile; cheap next to the N x N attention work.
    #      TODO(synk): hoist into its own pass for very large graphs.)
    wh_ref[...] = jnp.dot(x_ref[...], w_ref[...], preferred_element_type=jnp.float32)
    wh_all = wh_ref[...]                        # (N, nheads*nhid) f32
    wh_q = wh_ref[pl.ds(i0, T), :]              # (T, nheads*nhid) query rows

    bias = bias_ref[...].astype(jnp.float32)    # (T, N) additive adjacency bias

    head_outs = []
    for h in range(nheads):
        lo = h * nhid
        wh_h = wh_all[:, lo:lo + nhid]          # (N, nhid)
        whq_h = wh_q[:, lo:lo + nhid]           # (T, nhid)
        a1r = a1_ref[h:h + 1, :]                # (1, nhid)
        a2r = a2_ref[h:h + 1, :]                # (1, nhid)

        # attention logits via VPU reductions (no 1-lane MXU mat-vecs)
        f1 = jnp.sum(whq_h * a1r, axis=-1, keepdims=True)   # (T, 1)
        f2 = jnp.sum(wh_h * a2r, axis=-1, keepdims=True)    # (N, 1)
        e = f1 + f2.T                                       # (T, N)
        e = jnp.where(e > 0, e, alpha * e)                  # LeakyReLU
        e = e + bias                                        # adjacency mask

        # row softmax in f32; reciprocal routed to the EUP
        m = jnp.max(e, axis=1, keepdims=True)
        p = jnp.exp(e - m)
        denom = jnp.sum(p, axis=1, keepdims=True)
        att = p * pl.reciprocal(denom, approx=True)

        # neighbor aggregation on the MXU: bf16 operands, f32 accumulate
        agg = jnp.dot(att.astype(jnp.bfloat16), wh_h.astype(jnp.bfloat16),
                      preferred_element_type=jnp.float32)   # (T, nhid)

        # ELU (per-head for concat=True layers; GAT.forward applies it to the
        # output of the final concat=False layer — same position either way).
        head_outs.append(jnp.where(agg > 0, agg, jnp.exp(agg) - 1.0))

    hcat = head_outs[0] if nheads == 1 else jnp.concatenate(head_outs, axis=1)

    if final:
        # F.log_softmax(x, dim=1)
        mx = jnp.max(hcat, axis=1, keepdims=True)
        lse = jnp.log(jnp.sum(jnp.exp(hcat - mx), axis=1, keepdims=True)) + mx
        hcat = hcat - lse

    out_ref[...] = hcat.astype(out_ref.dtype)   # lane-dense (T, nheads*nhid) store


def gat_layer(x, bias, w_all, a1, a2, *, alpha, nheads, final, out_dtype):
    """Fused multi-head GraphAttentionLayer: one pallas_call for ALL heads."""
    n, f_in = x.shape
    hd = w_all.shape[1]
    nhid = hd // nheads
    t = _pick_row_tile(n)

    kernel = functools.partial(_gat_layer_kernel, alpha=alpha, nheads=nheads,
                               nhid=nhid, final=final)
    return pl.pallas_call(
        kernel,
        out_shape=jax.ShapeDtypeStruct((n, hd), out_dtype),
        grid=(n // t,),
        in_specs=[
            pl.BlockSpec((n, f_in), lambda i: (0, 0)),      # x: resident (fetched once)
            pl.BlockSpec((t, n), lambda i: (i, 0)),         # adjacency bias: streamed
            pl.BlockSpec(w_all.shape, lambda i: (0, 0)),    # stacked head weights
            pl.BlockSpec(a1.shape, lambda i: (0, 0)),       # a1 rows (nheads, nhid)
            pl.BlockSpec(a2.shape, lambda i: (0, 0)),       # a2 rows (nheads, nhid)
        ],
        out_specs=pl.BlockSpec((t, hd), lambda i: (i, 0)),
        scratch_shapes=[pltpu.VMEM((n, hd), jnp.float32)],  # Wh for all nodes
        compiler_params=pltpu.CompilerParams(
            dimension_semantics=("parallel",),              # megacore / v7x 2nd TC
            vmem_limit_bytes=_VMEM_LIMIT),
    )(x, bias, w_all, a1, a2)


# ----------------------------------------------------------------------------
# GAT forward (inference): fused multi-head layer -> fused output layer
# ----------------------------------------------------------------------------
def gat_forward(x, adj, params, *, alpha):
    heads = params["heads"]
    nheads = len(heads)
    nhid = heads[0][0].shape[1]

    # F.dropout(..., training=False) == identity (both dropout sites).
    # Additive adjacency bias, computed ONCE and shared by both layers.
    # NOTE: rows of adj with no nonzero entry degenerate to a plain softmax over
    # the leaky scores (no NaN); self-loops keep exact pyGAT semantics.
    bias = jnp.where(adj > 0, 0.0, _NEG_INF).astype(jnp.bfloat16)

    # Stack per-head parameters: W_all [F_in, nheads*nhid], a rows [nheads, nhid].
    w_all = jnp.concatenate([w for w, _ in heads], axis=1).astype(jnp.bfloat16)
    a1 = jnp.stack([a[:nhid, 0] for _, a in heads], axis=0)   # (nheads, nhid) f32
    a2 = jnp.stack([a[nhid:, 0] for _, a in heads], axis=0)

    h = gat_layer(x.astype(jnp.bfloat16), bias, w_all, a1, a2,
                  alpha=alpha, nheads=nheads, final=False,
                  out_dtype=jnp.bfloat16)                     # (N, nheads*nhid)

    w_out, a_out = params["out"]
    nclass = w_out.shape[1]
    # fused: out_att (concat=False) + F.elu + F.log_softmax(dim=1)
    return gat_layer(h, bias, w_out.astype(jnp.bfloat16),
                     a_out[:nclass].T, a_out[nclass:].T,
                     alpha=alpha, nheads=1, final=True,
                     out_dtype=jnp.float32)                   # (N, nclass) log-probs


# ----------------------------------------------------------------------------
# deterministic parameter init (xavier_uniform with gain=1.414, as in pyGAT)
# ----------------------------------------------------------------------------
def xavier_uniform(key, shape, gain=1.414):
    fan_in, fan_out = shape[0], shape[1]
    limit = gain * jnp.sqrt(6.0 / (fan_in + fan_out))
    return jax.random.uniform(key, shape, jnp.float32, -limit, limit)


def init_gat_params(key, nfeat, nhid, nclass, nheads):
    keys = jax.random.split(key, 2 * nheads + 2)
    heads = []
    for i in range(nheads):
        W = xavier_uniform(keys[2 * i], (nfeat, nhid))
        a = xavier_uniform(keys[2 * i + 1], (2 * nhid, 1))
        heads.append((W, a))
    W_out = xavier_uniform(keys[-2], (nhid * nheads, nclass))
    a_out = xavier_uniform(keys[-1], (2 * nclass, 1))
    return {"heads": heads, "out": (W_out, a_out)}


# ----------------------------------------------------------------------------
# pure-JAX reference mirroring the kernel's numerics policy
# (bf16 MXU operands, f32 accumulation/elementwise) for a tight check.
# ----------------------------------------------------------------------------
def _ref_layer(x_in, bias_f32, w, a1, a2, alpha, nheads, nhid, final):
    wh = jnp.dot(x_in.astype(jnp.bfloat16), w.astype(jnp.bfloat16),
                 preferred_element_type=jnp.float32)
    outs = []
    for h in range(nheads):
        whh = wh[:, h * nhid:(h + 1) * nhid]
        f1 = jnp.sum(whh * a1[h][None, :], axis=-1, keepdims=True)
        f2 = jnp.sum(whh * a2[h][None, :], axis=-1, keepdims=True)
        e = f1 + f2.T
        e = jnp.where(e > 0, e, alpha * e) + bias_f32
        att = jax.nn.softmax(e, axis=1)
        agg = jnp.dot(att.astype(jnp.bfloat16), whh.astype(jnp.bfloat16),
                      preferred_element_type=jnp.float32)
        outs.append(jnp.where(agg > 0, agg, jnp.exp(agg) - 1.0))
    out = outs[0] if nheads == 1 else jnp.concatenate(outs, axis=1)
    return jax.nn.log_softmax(out, axis=1) if final else out


def _ref_forward(x, adj, params, *, alpha):
    heads = params["heads"]
    nheads = len(heads)
    nhid = heads[0][0].shape[1]
    bias = jnp.where(adj > 0, 0.0, _NEG_INF).astype(jnp.bfloat16).astype(jnp.float32)
    w_all = jnp.concatenate([w for w, _ in heads], axis=1)
    a1 = jnp.stack([a[:nhid, 0] for _, a in heads], axis=0)
    a2 = jnp.stack([a[nhid:, 0] for _, a in heads], axis=0)
    h = _ref_layer(x, bias, w_all, a1, a2, alpha, nheads, nhid, False)
    h = h.astype(jnp.bfloat16)                    # layer-1 kernel output dtype
    w_out, a_out = params["out"]
    nclass = w_out.shape[1]
    a1o = a_out[:nclass, 0][None, :]
    a2o = a_out[nclass:, 0][None, :]
    return _ref_layer(h, bias, w_out, a1o, a2o, alpha, 1, nclass, True)


if __name__ == "__main__":
    # small shapes consistent with the module (two row tiles on the grid)
    N, nfeat, nhid, nclass, nheads = 128, 64, 16, 8, 4
    dropout, alpha = 0.6, 0.2   # dropout unused at inference

    key = jax.random.PRNGKey(0)
    k_x, k_adj, k_p = jax.random.split(key, 3)

    x = jax.random.normal(k_x, (N, nfeat), jnp.float32)
    # random adjacency with self-loops (every node has >= 1 neighbor)
    adj = (jax.random.uniform(k_adj, (N, N)) > 0.8).astype(jnp.float32)
    adj = jnp.maximum(adj, jnp.eye(N, dtype=jnp.float32))

    params = init_gat_params(k_p, nfeat, nhid, nclass, nheads)

    out = jax.block_until_ready(gat_forward(x, adj, params, alpha=alpha))
    assert out.shape == (N, nclass)

    ref = _ref_forward(x, adj, params, alpha=alpha)
    # bf16 MXU operands + approx reciprocal -> compare against a reference with
    # the same numerics policy under a matching (loosened) tolerance.
    assert jnp.allclose(out, ref, atol=2e-2, rtol=2e-2), "mismatch vs reference"

    print("KERNEL_OK")
</pallas_src>

<mosaic_0001>
module attributes {stable_mosaic.version = 11 : i64} {
  func.func @_gat_layer_kernel(%arg0: i32, %arg1: memref<128x64xbf16, #tpu.memory_space<vmem>>, %arg2: memref<64x128xbf16, #tpu.memory_space<vmem>>, %arg3: memref<64x64xbf16, #tpu.memory_space<vmem>>, %arg4: memref<4x16xf32, #tpu.memory_space<vmem>>, %arg5: memref<4x16xf32, #tpu.memory_space<vmem>>, %arg6: memref<64x64xbf16, #tpu.memory_space<vmem>>, %arg7: memref<128x64xf32, #tpu.memory_space<vmem>>) attributes {dimension_semantics = [#tpu.dimension_semantics<parallel>], iteration_bounds = array<i64: 2>, scalar_prefetch = 0 : i64, scratch_operands = 1 : i64, tpu.core_type = #tpu.core_type<tc>, window_params = [{pipeline_mode = #tpu.pipeline_mode<synchronous>, transform_indices = @transform_0, window_bounds = array<i64: 128, 64>}, {transform_indices = @transform_1, window_bounds = array<i64: 64, 128>}, {pipeline_mode = #tpu.pipeline_mode<synchronous>, transform_indices = @transform_2, window_bounds = array<i64: 64, 64>}, {pipeline_mode = #tpu.pipeline_mode<synchronous>, transform_indices = @transform_3, window_bounds = array<i64: 4, 16>}, {pipeline_mode = #tpu.pipeline_mode<synchronous>, transform_indices = @transform_4, window_bounds = array<i64: 4, 16>}, {transform_indices = @transform_5, window_bounds = array<i64: 64, 64>}]} {
    %c64_i32 = arith.constant 64 : i32
    %0 = arith.muli %arg0, %c64_i32 : i32
    %1 = tpu.assume_multiple %0, 64 : i32
    %c0 = arith.constant 0 : index
    %c0_0 = arith.constant 0 : index
    %2 = vector.load %arg1[%c0, %c0_0] : memref<128x64xbf16, #tpu.memory_space<vmem>>, vector<128x64xbf16>
    %c0_1 = arith.constant 0 : index
    %c0_2 = arith.constant 0 : index
    %3 = vector.load %arg3[%c0_1, %c0_2] : memref<64x64xbf16, #tpu.memory_space<vmem>>, vector<64x64xbf16>
    %cst = arith.constant dense<0.000000e+00> : vector<128x64xf32>
    %4 = tpu.matmul %2, %3, %cst {dimension_numbers = #tpu.dot_dimension_numbers<[1], [0], [0], [1], [0, 0, 1, 1], [], []>} : vector<128x64xbf16>, vector<64x64xbf16>, vector<128x64xf32> -> vector<128x64xf32>
    %c0_3 = arith.constant 0 : index
    %c0_4 = arith.constant 0 : index
    %5 = vector.load %arg7[%c0_3, %c0_4] : memref<128x64xf32, #tpu.memory_space<vmem>>, vector<128x64xf32>
    tpu.vector_store %arg7[%c0_3, %c0_4], %4 {strides = array<i32>} : memref<128x64xf32, #tpu.memory_space<vmem>>, vector<128x64xf32>,
    %c0_5 = arith.constant 0 : index
    %c0_6 = arith.constant 0 : index
    %6 = vector.load %arg7[%c0_5, %c0_6] : memref<128x64xf32, #tpu.memory_space<vmem>>, vector<128x64xf32>
    %7 = arith.index_cast %1 : i32 to index
    %c0_7 = arith.constant 0 : index
    %8 = vector.load %arg7[%7, %c0_7] : memref<128x64xf32, #tpu.memory_space<vmem>>, vector<64x64xf32>
    %c0_8 = arith.constant 0 : index
    %c0_9 = arith.constant 0 : index
    %9 = vector.load %arg2[%c0_8, %c0_9] : memref<64x128xbf16, #tpu.memory_space<vmem>>, vector<64x128xbf16>
    %10 = arith.extf %9 : vector<64x128xbf16> to vector<64x128xf32>
    %11 = vector.extract_strided_slice %6 {offsets = [0, 0], sizes = [128, 16], strides = [1, 1]} : vector<128x64xf32> to vector<128x16xf32>
    %12 = vector.extract_strided_slice %8 {offsets = [0, 0], sizes = [64, 16], strides = [1, 1]} : vector<64x64xf32> to vector<64x16xf32>
    %c0_10 = arith.constant 0 : index
    %c0_11 = arith.constant 0 : index
    %13 = vector.load %arg4[%c0_10, %c0_11] : memref<4x16xf32, #tpu.memory_space<vmem>>, vector<1x16xf32>
    %c0_12 = arith.constant 0 : index
    %c0_13 = arith.constant 0 : index
    %14 = vector.load %arg5[%c0_12, %c0_13] : memref<4x16xf32, #tpu.memory_space<vmem>>, vector<1x16xf32>
    %15 = vector.broadcast %13 : vector<1x16xf32> to vector<64x16xf32>
    %16 = arith.mulf %12, %15 : vector<64x16xf32>
    %cst_14 = arith.constant dense<0.000000e+00> : vector<64xf32>
    %17 = vector.multi_reduction <add>, %16, %cst_14 [1] : vector<64x16xf32> to vector<64xf32>
    %18 = vector.shape_cast %17 : vector<64xf32> to vector<64x1xf32>
    %19 = vector.broadcast %14 : vector<1x16xf32> to vector<128x16xf32>
    %20 = arith.mulf %11, %19 : vector<128x16xf32>
    %cst_15 = arith.constant dense<0.000000e+00> : vector<128xf32>
    %21 = vector.multi_reduction <add>, %20, %cst_15 [1] : vector<128x16xf32> to vector<128xf32>
    %22 = vector.shape_cast %21 : vector<128xf32> to vector<128x1xf32>
    %23 = tpu.transpose %22, [1, 0] : vector<128x1xf32> -> vector<1x128xf32>
    %24 = vector.broadcast %18 : vector<64x1xf32> to vector<64x128xf32>
    %25 = vector.broadcast %23 : vector<1x128xf32> to vector<64x128xf32>
    %26 = arith.addf %24, %25 : vector<64x128xf32>
    %cst_16 = arith.constant 0.000000e+00 : f32
    %27 = vector.broadcast %cst_16 : f32 to vector<64x128xf32>
    %28 = arith.cmpf ogt, %26, %27 : vector<64x128xf32>
    %cst_17 = arith.constant 2.000000e-01 : f32
    %29 = vector.broadcast %cst_17 : f32 to vector<64x128xf32>
    %30 = arith.mulf %29, %26 : vector<64x128xf32>
    %31 = arith.select %28, %26, %30 : vector<64x128xi1>, vector<64x128xf32>
    %32 = arith.addf %31, %10 : vector<64x128xf32>
    %cst_18 = arith.constant dense<0xFF800000> : vector<64xf32>
    %33 = vector.multi_reduction <maximumf>, %32, %cst_18 [1] : vector<64x128xf32> to vector<64xf32>
    %34 = vector.shape_cast %33 : vector<64xf32> to vector<64x1xf32>
    %35 = vector.broadcast %34 : vector<64x1xf32> to vector<64x128xf32>
    %36 = arith.subf %32, %35 : vector<64x128xf32>
    %37 = math.exp %36 : vector<64x128xf32>
    %cst_19 = arith.constant dense<0.000000e+00> : vector<64xf32>
    %38 = vector.multi_reduction <add>, %37, %cst_19 [1] : vector<64x128xf32> to vector<64xf32>
    %39 = vector.shape_cast %38 : vector<64xf32> to vector<64x1xf32>
    %40 = tpu.reciprocal %39 {approx = true} : vector<64x1xf32> -> vector<64x1xf32>
    %41 = vector.broadcast %40 : vector<64x1xf32> to vector<64x128xf32>
    %42 = arith.mulf %37, %41 : vector<64x128xf32>
    %43 = arith.truncf %42 : vector<64x128xf32> to vector<64x128xbf16>
    %44 = arith.truncf %11 : vector<128x16xf32> to vector<128x16xbf16>
    %cst_20 = arith.constant dense<0.000000e+00> : vector<64x16xf32>
    %45 = tpu.matmul %43, %44, %cst_20 {dimension_numbers = #tpu.dot_dimension_numbers<[1], [0], [0], [1], [0, 0, 1, 1], [], []>} : vector<64x128xbf16>, vector<128x16xbf16>, vector<64x16xf32> -> vector<64x16xf32>
    %cst_21 = arith.constant 0.000000e+00 : f32
    %46 = vector.broadcast %cst_21 : f32 to vector<64x16xf32>
    %47 = arith.cmpf ogt, %45, %46 : vector<64x16xf32>
    %48 = math.exp %45 : vector<64x16xf32>
    %cst_22 = arith.constant 1.000000e+00 : f32
    %49 = vector.broadcast %cst_22 : f32 to vector<64x16xf32>
    %50 = arith.subf %48, %49 : vector<64x16xf32>
    %51 = arith.select %47, %45, %50 : vector<64x16xi1>, vector<64x16xf32>
    %52 = vector.extract_strided_slice %6 {offsets = [0, 16], sizes = [128, 16], strides = [1, 1]} : vector<128x64xf32> to vector<128x16xf32>
    %53 = vector.extract_strided_slice %8 {offsets = [0, 16], sizes = [64, 16], strides = [1, 1]} : vector<64x64xf32> to vector<64x16xf32>
    %c1 = arith.constant 1 : index
    %c0_23 = arith.constant 0 : index
    %54 = vector.load %arg4[%c1, %c0_23] : memref<4x16xf32, #tpu.memory_space<vmem>>, vector<1x16xf32>
    %c1_24 = arith.constant 1 : index
    %c0_25 = arith.constant 0 : index
    %55 = vector.load %arg5[%c1_24, %c0_25] : memref<4x16xf32, #tpu.memory_space<vmem>>, vector<1x16xf32>
    %56 = vector.broadcast %54 : vector<1x16xf32> to vector<64x16xf32>
    %57 = arith.mulf %53, %56 : vector<64x16xf32>
    %cst_26 = arith.constant dense<0.000000e+00> : vector<64xf32>
    %58 = vector.multi_reduction <add>, %57, %cst_26 [1] : vector<64x16xf32> to vector<64xf32>
    %59 = vector.shape_cast %58 : vector<64xf32> to vector<64x1xf32>
    %60 = vector.broadcast %55 : vector<1x16xf32> to vector<128x16xf32>
    %61 = arith.mulf %52, %60 : vector<128x16xf32>
    %cst_27 = arith.constant dense<0.000000e+00> : vector<128xf32>
    %62 = vector.multi_reduction <add>, %61, %cst_27 [1] : vector<128x16xf32> to vector<128xf32>
    %63 = vector.shape_cast %62 : vector<128xf32> to vector<128x1xf32>
    %64 = tpu.transpose %63, [1, 0] : vector<128x1xf32> -> vector<1x128xf32>
    %65 = vector.broadcast %59 : vector<64x1xf32> to vector<64x128xf32>
    %66 = vector.broadcast %64 : vector<1x128xf32> to vector<64x128xf32>
    %67 = arith.addf %65, %66 : vector<64x128xf32>
    %cst_28 = arith.constant 0.000000e+00 : f32
    %68 = vector.broadcast %cst_28 : f32 to vector<64x128xf32>
    %69 = arith.cmpf ogt, %67, %68 : vector<64x128xf32>
    %cst_29 = arith.constant 2.000000e-01 : f32
    %70 = vector.broadcast %cst_29 : f32 to vector<64x128xf32>
    %71 = arith.mulf %70, %67 : vector<64x128xf32>
    %72 = arith.select %69, %67, %71 : vector<64x128xi1>, vector<64x128xf32>
    %73 = arith.addf %72, %10 : vector<64x128xf32>
    %cst_30 = arith.constant dense<0xFF800000> : vector<64xf32>
    %74 = vector.multi_reduction <maximumf>, %73, %cst_30 [1] : vector<64x128xf32> to vector<64xf32>
    %75 = vector.shape_cast %74 : vector<64xf32> to vector<64x1xf32>
    %76 = vector.broadcast %75 : vector<64x1xf32> to vector<64x128xf32>
    %77 = arith.subf %73, %76 : vector<64x128xf32>
    %78 = math.exp %77 : vector<64x128xf32>
    %cst_31 = arith.constant dense<0.000000e+00> : vector<64xf32>
    %79 = vector.multi_reduction <add>, %78, %cst_31 [1] : vector<64x128xf32> to vector<64xf32>
    %80 = vector.shape_cast %79 : vector<64xf32> to vector<64x1xf32>
    %81 = tpu.reciprocal %80 {approx = true} : vector<64x1xf32> -> vector<64x1xf32>
    %82 = vector.broadcast %81 : vector<64x1xf32> to vector<64x128xf32>
    %83 = arith.mulf %78, %82 : vector<64x128xf32>
    %84 = arith.truncf %83 : vector<64x128xf32> to vector<64x128xbf16>
    %85 = arith.truncf %52 : vector<128x16xf32> to vector<128x16xbf16>
    %cst_32 = arith.constant dense<0.000000e+00> : vector<64x16xf32>
    %86 = tpu.matmul %84, %85, %cst_32 {dimension_numbers = #tpu.dot_dimension_numbers<[1], [0], [0], [1], [0, 0, 1, 1], [], []>} : vector<64x128xbf16>, vector<128x16xbf16>, vector<64x16xf32> -> vector<64x16xf32>
    %cst_33 = arith.constant 0.000000e+00 : f32
    %87 = vector.broadcast %cst_33 : f32 to vector<64x16xf32>
    %88 = arith.cmpf ogt, %86, %87 : vector<64x16xf32>
    %89 = math.exp %86 : vector<64x16xf32>
    %cst_34 = arith.constant 1.000000e+00 : f32
    %90 = vector.broadcast %cst_34 : f32 to vector<64x16xf32>
    %91 = arith.subf %89, %90 : vector<64x16xf32>
    %92 = arith.select %88, %86, %91 : vector<64x16xi1>, vector<64x16xf32>
    %93 = vector.extract_strided_slice %6 {offsets = [0, 32], sizes = [128, 16], strides = [1, 1]} : vector<128x64xf32> to vector<128x16xf32>
    %94 = vector.extract_strided_slice %8 {offsets = [0, 32], sizes = [64, 16], strides = [1, 1]} : vector<64x64xf32> to vector<64x16xf32>
    %c2 = arith.constant 2 : index
    %c0_35 = arith.constant 0 : index
    %95 = vector.load %arg4[%c2, %c0_35] : memref<4x16xf32, #tpu.memory_space<vmem>>, vector<1x16xf32>
    %c2_36 = arith.constant 2 : index
    %c0_37 = arith.constant 0 : index
    %96 = vector.load %arg5[%c2_36, %c0_37] : memref<4x16xf32, #tpu.memory_space<vmem>>, vector<1x16xf32>
    %97 = vector.broadcast %95 : vector<1x16xf32> to vector<64x16xf32>
    %98 = arith.mulf %94, %97 : vector<64x16xf32>
    %cst_38 = arith.constant dense<0.000000e+00> : vector<64xf32>
    %99 = vector.multi_reduction <add>, %98, %cst_38 [1] : vector<64x16xf32> to vector<64xf32>
    %100 = vector.shape_cast %99 : vector<64xf32> to vector<64x1xf32>
    %101 = vector.broadcast %96 : vector<1x16xf32> to vector<128x16xf32>
    %102 = arith.mulf %93, %101 : vector<128x16xf32>
    %cst_39 = arith.constant dense<0.000000e+00> : vector<128xf32>
    %103 = vector.multi_reduction <add>, %102, %cst_39 [1] : vector<128x16xf32> to vector<128xf32>
    %104 = vector.shape_cast %103 : vector<128xf32> to vector<128x1xf32>
    %105 = tpu.transpose %104, [1, 0] : vector<128x1xf32> -> vector<1x128xf32>
    %106 = vector.broadcast %100 : vector<64x1xf32> to vector<64x128xf32>
    %107 = vector.broadcast %105 : vector<1x128xf32> to vector<64x128xf32>
    %108 = arith.addf %106, %107 : vector<64x128xf32>
    %cst_40 = arith.constant 0.000000e+00 : f32
    %109 = vector.broadcast %cst_40 : f32 to vector<64x128xf32>
    %110 = arith.cmpf ogt, %108, %109 : vector<64x128xf32>
    %cst_41 = arith.constant 2.000000e-01 : f32
    %111 = vector.broadcast %cst_41 : f32 to vector<64x128xf32>
    %112 = arith.mulf %111, %108 : vector<64x128xf32>
    %113 = arith.select %110, %108, %112 : vector<64x128xi1>, vector<64x128xf32>
    %114 = arith.addf %113, %10 : vector<64x128xf32>
    %cst_42 = arith.constant dense<0xFF800000> : vector<64xf32>
    %115 = vector.multi_reduction <maximumf>, %114, %cst_42 [1] : vector<64x128xf32> to vector<64xf32>
    %116 = vector.shape_cast %115 : vector<64xf32> to vector<64x1xf32>
    %117 = vector.broadcast %116 : vector<64x1xf32> to vector<64x128xf32>
    %118 = arith.subf %114, %117 : vector<64x128xf32>
    %119 = math.exp %118 : vector<64x128xf32>
    %cst_43 = arith.constant dense<0.000000e+00> : vector<64xf32>
    %120 = vector.multi_reduction <add>, %119, %cst_43 [1] : vector<64x128xf32> to vector<64xf32>
    %121 = vector.shape_cast %120 : vector<64xf32> to vector<64x1xf32>
    %122 = tpu.reciprocal %121 {approx = true} : vector<64x1xf32> -> vector<64x1xf32>
    %123 = vector.broadcast %122 : vector<64x1xf32> to vector<64x128xf32>
    %124 = arith.mulf %119, %123 : vector<64x128xf32>
    %125 = arith.truncf %124 : vector<64x128xf32> to vector<64x128xbf16>
    %126 = arith.truncf %93 : vector<128x16xf32> to vector<128x16xbf16>
    %cst_44 = arith.constant dense<0.000000e+00> : vector<64x16xf32>
    %127 = tpu.matmul %125, %126, %cst_44 {dimension_numbers = #tpu.dot_dimension_numbers<[1], [0], [0], [1], [0, 0, 1, 1], [], []>} : vector<64x128xbf16>, vector<128x16xbf16>, vector<64x16xf32> -> vector<64x16xf32>
    %cst_45 = arith.constant 0.000000e+00 : f32
    %128 = vector.broadcast %cst_45 : f32 to vector<64x16xf32>
    %129 = arith.cmpf ogt, %127, %128 : vector<64x16xf32>
    %130 = math.exp %127 : vector<64x16xf32>
    %cst_46 = arith.constant 1.000000e+00 : f32
    %131 = vector.broadcast %cst_46 : f32 to vector<64x16xf32>
    %132 = arith.subf %130, %131 : vector<64x16xf32>
    %133 = arith.select %129, %127, %132 : vector<64x16xi1>, vector<64x16xf32>
    %134 = vector.extract_strided_slice %6 {offsets = [0, 48], sizes = [128, 16], strides = [1, 1]} : vector<128x64xf32> to vector<128x16xf32>
    %135 = vector.extract_strided_slice %8 {offsets = [0, 48], sizes = [64, 16], strides = [1, 1]} : vector<64x64xf32> to vector<64x16xf32>
    %c3 = arith.constant 3 : index
    %c0_47 = arith.constant 0 : index
    %136 = vector.load %arg4[%c3, %c0_47] : memref<4x16xf32, #tpu.memory_space<vmem>>, vector<1x16xf32>
    %c3_48 = arith.constant 3 : index
    %c0_49 = arith.constant 0 : index
    %137 = vector.load %arg5[%c3_48, %c0_49] : memref<4x16xf32, #tpu.memory_space<vmem>>, vector<1x16xf32>
    %138 = vector.broadcast %136 : vector<1x16xf32> to vector<64x16xf32>
    %139 = arith.mulf %135, %138 : vector<64x16xf32>
    %cst_50 = arith.constant dense<0.000000e+00> : vector<64xf32>
    %140 = vector.multi_reduction <add>, %139, %cst_50 [1] : vector<64x16xf32> to vector<64xf32>
    %141 = vector.shape_cast %140 : vector<64xf32> to vector<64x1xf32>
    %142 = vector.broadcast %137 : vector<1x16xf32> to vector<128x16xf32>
    %143 = arith.mulf %134, %142 : vector<128x16xf32>
    %cst_51 = arith.constant dense<0.000000e+00> : vector<128xf32>
    %144 = vector.multi_reduction <add>, %143, %cst_51 [1] : vector<128x16xf32> to vector<128xf32>
    %145 = vector.shape_cast %144 : vector<128xf32> to vector<128x1xf32>
    %146 = tpu.transpose %145, [1, 0] : vector<128x1xf32> -> vector<1x128xf32>
    %147 = vector.broadcast %141 : vector<64x1xf32> to vector<64x128xf32>
    %148 = vector.broadcast %146 : vector<1x128xf32> to vector<64x128xf32>
    %149 = arith.addf %147, %148 : vector<64x128xf32>
    %cst_52 = arith.constant 0.000000e+00 : f32
    %150 = vector.broadcast %cst_52 : f32 to vector<64x128xf32>
    %151 = arith.cmpf ogt, %149, %150 : vector<64x128xf32>
    %cst_53 = arith.constant 2.000000e-01 : f32
    %152 = vector.broadcast %cst_53 : f32 to vector<64x128xf32>
    %153 = arith.mulf %152, %149 : vector<64x128xf32>
    %154 = arith.select %151, %149, %153 : vector<64x128xi1>, vector<64x128xf32>
    %155 = arith.addf %154, %10 : vector<64x128xf32>
    %cst_54 = arith.constant dense<0xFF800000> : vector<64xf32>
    %156 = vector.multi_reduction <maximumf>, %155, %cst_54 [1] : vector<64x128xf32> to vector<64xf32>
    %157 = vector.shape_cast %156 : vector<64xf32> to vector<64x1xf32>
    %158 = vector.broadcast %157 : vector<64x1xf32> to vector<64x128xf32>
    %159 = arith.subf %155, %158 : vector<64x128xf32>
    %160 = math.exp %159 : vector<64x128xf32>
    %cst_55 = arith.constant dense<0.000000e+00> : vector<64xf32>
    %161 = vector.multi_reduction <add>, %160, %cst_55 [1] : vector<64x128xf32> to vector<64xf32>
    %162 = vector.shape_cast %161 : vector<64xf32> to vector<64x1xf32>
    %163 = tpu.reciprocal %162 {approx = true} : vector<64x1xf32> -> vector<64x1xf32>
    %164 = vector.broadcast %163 : vector<64x1xf32> to vector<64x128xf32>
    %165 = arith.mulf %160, %164 : vector<64x128xf32>
    %166 = arith.truncf %165 : vector<64x128xf32> to vector<64x128xbf16>
    %167 = arith.truncf %134 : vector<128x16xf32> to vector<128x16xbf16>
    %cst_56 = arith.constant dense<0.000000e+00> : vector<64x16xf32>
    %168 = tpu.matmul %166, %167, %cst_56 {dimension_numbers = #tpu.dot_dimension_numbers<[1], [0], [0], [1], [0, 0, 1, 1], [], []>} : vector<64x128xbf16>, vector<128x16xbf16>, vector<64x16xf32> -> vector<64x16xf32>
    %cst_57 = arith.constant 0.000000e+00 : f32
    %169 = vector.broadcast %cst_57 : f32 to vector<64x16xf32>
    %170 = arith.cmpf ogt, %168, %169 : vector<64x16xf32>
    %171 = math.exp %168 : vector<64x16xf32>
    %cst_58 = arith.constant 1.000000e+00 : f32
    %172 = vector.broadcast %cst_58 : f32 to vector<64x16xf32>
    %173 = arith.subf %171, %172 : vector<64x16xf32>
    %174 = arith.select %170, %168, %173 : vector<64x16xi1>, vector<64x16xf32>
    %175 = tpu.concatenate %51, %92, %133, %174 in 1 : vector<64x16xf32>, vector<64x16xf32>, vector<64x16xf32>, vector<64x16xf32> -> vector<64x64xf32>
    %176 = arith.truncf %175 : vector<64x64xf32> to vector<64x64xbf16>
    %c0_59 = arith.constant 0 : index
    %c0_60 = arith.constant 0 : index
    %177 = vector.load %arg6[%c0_59, %c0_60] : memref<64x64xbf16, #tpu.memory_space<vmem>>, vector<64x64xbf16>
    tpu.vector_store %arg6[%c0_59, %c0_60], %176 {strides = array<i32>} : memref<64x64xbf16, #tpu.memory_space<vmem>>, vector<64x64xbf16>,
    return
  }
  func.func @transform_0(%arg0: i32) -> (i32, i32) {
    %c0_i32 = arith.constant 0 : i32
    %c0_i32_0 = arith.constant 0 : i32
    %c0_i32_1 = arith.constant 0 : i32
    return %c0_i32, %c0_i32_0 : i32, i32
  }
  func.func @transform_1(%arg0: i32) -> (i32, i32) {
    %c0_i32 = arith.constant 0 : i32
    %c0_i32_0 = arith.constant 0 : i32
    return %arg0, %c0_i32 : i32, i32
  }
  func.func @transform_2(%arg0: i32) -> (i32, i32) {
    %c0_i32 = arith.constant 0 : i32
    %c0_i32_0 = arith.constant 0 : i32
    %c0_i32_1 = arith.constant 0 : i32
    return %c0_i32, %c0_i32_0 : i32, i32
  }
  func.func @transform_3(%arg0: i32) -> (i32, i32) {
    %c0_i32 = arith.constant 0 : i32
    %c0_i32_0 = arith.constant 0 : i32
    %c0_i32_1 = arith.constant 0 : i32
    return %c0_i32, %c0_i32_0 : i32, i32
  }
  func.func @transform_4(%arg0: i32) -> (i32, i32) {
    %c0_i32 = arith.constant 0 : i32
    %c0_i32_0 = arith.constant 0 : i32
    %c0_i32_1 = arith.constant 0 : i32
    return %c0_i32, %c0_i32_0 : i32, i32
  }
  func.func @transform_5(%arg0: i32) -> (i32, i32) {
    %c0_i32 = arith.constant 0 : i32
    %c0_i32_0 = arith.constant 0 : i32
    return %arg0, %c0_i32 : i32, i32
  }
}

</mosaic_0001>

<bundles_post_ra>
// kernel: tpu_custom_call.1
= control target key start
LH: loop header
LB: loop body
LE: loop exit
PB: predicated region body
PF: predicated region fallthrough
CT: control target
= control target key end

     0   :  { %s3180_s18 = smov 0   ;;  %s4619_s0 = inlined_call_operand.vmem [shape: bf16[128,64], index: 0, kind: input, shape index: {}]   ;;  %s4620_s1 = inlined_call_operand.vmem [shape: bf16[128,128], index: 1, kind: input, shape index: {}]   ;;  %s4621_s2 = inlined_call_operand.vmem [shape: bf16[64,64], index: 2, kind: input, shape index: {}]   ;;  %s4622_s3 = inlined_call_operand.vmem [shape: f32[4,16], index: 3, kind: input, shape index: {}]   ;;  %s4623_s4 = inlined_call_operand.vmem [shape: f32[4,16], index: 4, kind: input, shape index: {}]   ;;  %s4624_s5 = inlined_call_operand.vmem [shape: bf16[128,64], index: 5, kind: output, shape index: {}]  }
   0x1 LB: > { %s2571_s19 = sadd.s32 4294967295, %s3142_s18   ;;  %p2575_p0 = scmp.ge.s32.totalorder %s3142_s18, 1  ;;  %s3142_s18 = sphi %s3180_s18, %s15_s18  }
   0x2   : > { %p188_p1 = scmp.lt.s32.totalorder %s3142_s18, 3 }
   0x4   : > { %p189_p2 = pnand %p2575_p0, %p188_p1 }
   0x6   : > { %192 = sbr.rel (%p189_p2) target bundleno = 2417 (0x971), region = 40 }
   0xd   : > { %v2932_v0 = vld [vmem:[%s4621_s2] sm:$0xff]   ;;  %v2933_v1 = vld [vmem:[%s4621_s2 + $0x8] sm:$0xff]   ;;  %v2934_v2 = vld [vmem:[%s4621_s2 + $0x10] sm:$0xff]   ;;  %vm318_vm0 = vcmask 523264   ;;  %s3144_s9 = smov 16   ;;  %s3145_s10 = smov 32  }
   0xe   : > { %2738 = vmatprep.subr.bf16.mxu0 %v2932_v0  ;;  %v2936_v3 = vld [vmem:[%s4619_s0] sm:$0xff]   ;;  %v2935_v4 = vld [vmem:[%s4621_s2 + $0x18] sm:$0xff]   ;;  %v2937_v7 = vld [vmem:[%s4619_s0 + $0x8] sm:$0xff]   ;;  %s3146_s25 = smov 48   ;;  %s3147_s13 = smov 96   ;;  %vm511_vm1 = vcmask 130048  }
   0xf   : > { %2739 = vmatpush3.bf16.msra.mxu0 %v2932_v0  ;;  %2746 = vmatprep.mubr.msk.bf16.mxu0 %vm318_vm0, %v2936_v3  ;;  %v2611_v5 = vld [vmem:[%s4622_s3 + $0x1] ss:$0 sm:$0xff]  ;;  %v2622_v6 = vld [vmem:[%s4623_s4 + $0x2] ss:$0 sm:$0xff]  ;;  %v2938_v10 = vld [vmem:[%s4619_s0 + $0x10] sm:$0xff]   ;;  %s3148_s14 = smov 112  }
  0x10   : > { %2740 = vmatprep.subr.bf16.mxu0 %v2933_v1  ;;  %876 = vrot.lane.b32.xlu1 %v2611_v5, %s3144_s9  ;;  %v2612_v8 = vld [vmem:[%s4623_s4 + $0x1] ss:$0 sm:$0xff]  ;;  %v2621_v9 = vld [vmem:[%s4622_s3 + $0x2] ss:$0 sm:$0xff]  ;;  %v2632_v11 = vld [vmem:[%s4623_s4 + $0x3] ss:$0 sm:$0xff] }
  0x11   : > { %1447 = vrot.lane.b32.xlu0 %v2622_v6, %s3145_s10  ;;  %v2631_v12 = vld [vmem:[%s4622_s3 + $0x3] ss:$0 sm:$0xff]  ;;  %v2939_v13 = vld [vmem:[%s4619_s0 + $0x18] sm:$0xff]   ;;  %v2941_v15 = vld [vmem:[%s4619_s0 + $0x28] sm:$0xff]   ;;  %s3149_s15 = smov 80   ;;  %s2580_s16 = sshll.u32 %s2571_s19, 6 }
  0x12   : > { %v2940_v14 = vld [vmem:[%s4619_s0 + $0x20] sm:$0xff]   ;;  %v2942_v16 = vld [vmem:[%s4619_s0 + $0x30] sm:$0xff]   ;;  %v2943_v17 = vld [vmem:[%s4619_s0 + $0x38] sm:$0xff]   ;;  %s3335_s23 = scalar_lea.vmem [#allocation2], %s2580_s16  ;;  %s2576_s24 = sshll.u32 %s2571_s19, 3 }
  0x13   : > { %2741 = vmatpush3.bf16.msra.mxu0 %v2933_v1  ;;  %v3327_v54 = vld [vmem:[%s4623_s4] ss:$0 sm:$0xff]  ;;  %p217_p3 = scmp.lt.s32.totalorder %s2576_s24, 15 }
  0x14   : > { %2742 = vmatprep.subr.bf16.mxu0 %v2934_v2  ;;  %948 = vrot.lane.b32.xlu1 %v2612_v8, %s3144_s9  ;;  %v3333_v55 = vld [vmem:[%s4622_s3] ss:$0 sm:$0xff] }
  0x15   : > { %1375 = vrot.lane.b32.xlu0 %v2621_v9, %s3145_s10  ;;  %s4670_s24 = smov (!%p217_p3, %s2576_s24), 15 }
  0x16   : > { %s2577_s19 = sshll.u32 %s4670_s24, 2 }
  0x17   : > { %2743 = vmatpush3.bf16.msra.mxu0 %v2934_v2  ;;  %s3817_s28 = scalar_lea.vmem %s4620_s1, %s2577_s19 }
  0x18   : > { %2744 = vmatprep.subr.bf16.mxu0 %v2935_v4  ;;  %1938 = vrot.lane.b32.xlu1 %v2632_v11, %s3146_s25 }
  0x19   : > { %1866 = vrot.lane.b32.xlu0 %v2631_v12, %s3146_s25 }
  0x1b   : > { %2745 = vmatpush3.bf16.msra.mxu0 %v2935_v4 }
  0x1e   : > { %2747 = vmatmul.mubr.msk.bf16.vlgmr.msra.gmra.mrb[0].mxu0 %vm318_vm0, %v2937_v7 }
  0x1f   : > { %2750 = vmatprep.mubr.msk.bf16.mxu0 %vm318_vm0, %v2938_v10 }
  0x26   : > { %2751 = vmatmul.mubr.msk.bf16.gmra.mrb[4].mxu0 %vm318_vm0, %v2939_v13 }
  0x27   : > { %2754 = vmatprep.mubr.msk.bf16.mxu0 %vm318_vm0, %v2940_v14 }
  0x2e   : > { %2755 = vmatmul.mubr.msk.bf16.gmra.mrb[8].mxu0 %vm318_vm0, %v2941_v15 }
  0x2f   : > { %2758 = vmatprep.mubr.msk.bf16.mxu0 %vm318_vm0, %v2942_v16 }
  0x36   : > { %2759 = vmatmul.mubr.msk.bf16.gmra.mrb[12].mxu0 %vm318_vm0, %v2943_v17 }
  0x82   : > { %v3256_v18 = vpop.permute.xlu1 %876 }
  0x83   : > { %v3264_v24 = vpop.permute.xlu0 %1447 }
  0x86   : > { %v3262_v23 = vpop.permute.xlu1 %948 }
  0x8a   : > { %v3269_v30 = vpop.permute.xlu1 %1938 }
  0xf1   : > { %v2748_v19 = vpop.f32.mrb[0].mxu0 }
  0xf2   : > { %442 = vst.msk [vmem:[#allocation2 + $0x10] sm:$0xff] %vm318_vm0, %v2748_v19  ;;  %v377_v20 = vpop.f32.mrb[1].mxu0 }
  0xf3   : > { %440 = vst.msk [vmem:[#allocation2] sm:$0xff] %vm318_vm0, %v377_v20  ;;  %v2749_v21 = vpop.f32.mrb[2].mxu0 }
  0xf4   : > { %443 = vst.msk [vmem:[#allocation2 + $0x18] sm:$0xff] %vm318_vm0, %v2749_v21  ;;  %v380_v22 = vpop.f32.mrb[3].mxu0 }
  0xf5   : > { %441 = vst.msk [vmem:[#allocation2 + $0x8] sm:$0xff] %vm318_vm0, %v380_v22 }
  0xf9   : > { %v2752_v25 = vpop.f32.mrb[4].mxu0  ;;  %v458_v26 = vld [vmem:[#allocation2 + $0x10] sm:$0xff] }
  0xfa   : > { %446 = vst.msk [vmem:[#allocation2 + $0x30] sm:$0xff] %vm318_vm0, %v2752_v25  ;;  %v393_v27 = vpop.f32.mrb[5].mxu0  ;;  %v1452_v28 = vmul.f32 %v3264_v24, %v458_v26  ;;  %v953_v29 = vmul.f32 %v3262_v23, %v458_v26  ;;  %v3277_v34 = vld [vmem:[#allocation2] sm:$0xff]  ;;  %v1943_v37 = vmul.f32 %v3269_v30, %v458_v26  ;;  %v542_v57 = vmul.f32 %v3327_v54, %v458_v26 }
  0xfb   : > { %444 = vst.msk [vmem:[#allocation2 + $0x20] sm:$0xff] %vm318_vm0, %v393_v27  ;;  %v2753_v31 = vpop.f32.mrb[6].mxu0  ;;  %v3272_v32 = vld [vmem:[#allocation2 + $0x18] sm:$0xff]  ;;  %v951_v62 = vmul.f32 %v3262_v23, %v3277_v34  ;;  %v1450_v0 = vmul.f32 %v3264_v24, %v3277_v34  ;;  %v1941_v1 = vmul.f32 %v3269_v30, %v3277_v34  ;;  %v540_v6 = vmul.f32 %v3327_v54, %v3277_v34 }
  0xfc   : > { %447 = vst.msk [vmem:[#allocation2 + $0x38] sm:$0xff] %vm318_vm0, %v2753_v31  ;;  %1486 = vrot.lane.b32.xlu0 %v1452_v28, %s3147_s13  ;;  %987 = vrot.lane.b32.xlu1 %v953_v29, %s3148_s14  ;;  %v396_v33 = vpop.f32.mrb[7].mxu0  ;;  %v3279_v35 = vld [vmem:[#allocation2 + $0x8] sm:$0xff]  ;;  %v954_v38 = vmul.f32 %v3262_v23, %v3272_v32  ;;  %v3293_v39 = vpack.c.bf16 %v3272_v32, %v458_v26  ;;  %v562_v59 = vsel %vm511_vm1, %v542_v57, 0.0 }
  0xfd   : > { %445 = vst.msk [vmem:[#allocation2 + $0x28] sm:$0xff] %vm318_vm0, %v396_v33  ;;  %v3284_v36 = vpack.c.bf16 %v3279_v35, %v3277_v34  ;;  %v543_v60 = vmul.f32 %v3327_v54, %v3272_v32  ;;  %v952_v63 = vmul.f32 %v3262_v23, %v3279_v35  ;;  %v541_v2 = vmul.f32 %v3327_v54, %v3279_v35 }
  0xfe   : > { %4648 = vst [vmem:[#allocation4_spill] sm:$0xff] %v3293_v39  ;;  %v556_v8 = vsel %vm511_vm1, %v540_v6, 0.0  ;;  %v1453_v14 = vmul.f32 %v3264_v24, %v3272_v32  ;;  %v1944_v15 = vmul.f32 %v3269_v30, %v3272_v32  ;;  %v1451_v16 = vmul.f32 %v3264_v24, %v3279_v35 }
  0xff   : > { %4647 = vst [vmem:[#allocation3_spill] sm:$0xff] %v3284_v36  ;;  %2762 = vmatprep.subr.bf16.mxu1 %v3284_v36  ;;  %v565_v61 = vsel %vm511_vm1, %v543_v60, 0.0  ;;  %v559_v7 = vsel %vm511_vm1, %v541_v2, 0.0  ;;  %v1942_v17 = vmul.f32 %v3269_v30, %v3279_v35 }
 0x100   : > { %1977 = vrot.lane.b32.xlu0 %v1943_v37, %s3149_s15  ;;  %989 = vrot.lane.b32.xlu1 %v954_v38, %s3148_s14 }
 0x101   : > { %2763 = vmatpush3.bf16.msra.mxu1 %v3284_v36  ;;  %v2756_v40 = vpop.f32.mrb[8].mxu0  ;;  %v3308_v48 = vld [vmem:[#allocation2 + $0x30] sm:$0xff] }
 0x102   : > { %450 = vst.msk [vmem:[#allocation2 + $0x50] sm:$0xff] %vm318_vm0, %v2756_v40  ;;  %2764 = vmatprep.subr.bf16.mxu1 %v3293_v39  ;;  %v409_v41 = vpop.f32.mrb[9].mxu0  ;;  %v3310_v49 = vld [vmem:[#allocation2 + $0x20] sm:$0xff]  ;;  %v957_v12 = vmul.f32 %v3262_v23, %v3308_v48  ;;  %v546_v25 = vmul.f32 %v3327_v54, %v3308_v48 }
 0x103   : > { %448 = vst.msk [vmem:[#allocation2 + $0x40] sm:$0xff] %vm318_vm0, %v409_v41  ;;  %v2757_v42 = vpop.f32.mrb[10].mxu0  ;;  %v3312_v50 = vld [vmem:[#allocation2 + $0x38] sm:$0xff]  ;;  %v955_v13 = vmul.f32 %v3262_v23, %v3310_v49  ;;  %v1454_v37 = vmul.f32 %v3264_v24, %v3310_v49  ;;  %v1945_v38 = vmul.f32 %v3269_v30, %v3310_v49 }
 0x104   : > { %451 = vst.msk [vmem:[#allocation2 + $0x58] sm:$0xff] %vm318_vm0, %v2757_v42  ;;  %v412_v43 = vpop.f32.mrb[11].mxu0  ;;  %v3314_v51 = vld [vmem:[#allocation2 + $0x28] sm:$0xff]  ;;  %v3322_v53 = vpack.c.bf16 %v3312_v50, %v3308_v48  ;;  %v547_v19 = vmul.f32 %v3327_v54, %v3312_v50  ;;  %v574_v26 = vsel %vm511_vm1, %v546_v25, 0.0  ;;  %v958_v57 = vmul.f32 %v3262_v23, %v3312_v50 }
 0x105   : > { %449 = vst.msk [vmem:[#allocation2 + $0x48] sm:$0xff] %vm318_vm0, %v412_v43  ;;  %2765 = vmatpush3.bf16.msra.mxu1 %v3293_v39  ;;  %v3318_v52 = vpack.c.bf16 %v3314_v51, %v3310_v49  ;;  %v545_v21 = vmul.f32 %v3327_v54, %v3314_v51 }
 0x106   : > { %4650 = vst [vmem:[#allocation6_spill] sm:$0xff] %v3322_v53  ;;  %v577_v20 = vsel %vm511_vm1, %v547_v19, 0.0 }
 0x107   : > { %4649 = vst [vmem:[#allocation5_spill] sm:$0xff] %v3318_v52  ;;  %2766 = vmatprep.subr.bf16.mxu1 %v3318_v52  ;;  %v571_v22 = vsel %vm511_vm1, %v545_v21, 0.0 }
 0x109   : > { %v2760_v44 = vpop.f32.mrb[12].mxu0  ;;  %2767 = vmatpush3.bf16.msra.mxu1 %v3318_v52  ;;  %v3380_v9 = vld [vmem:[#allocation2 + $0x50] sm:$0xff] }
 0x10a   : > { %454 = vst.msk [vmem:[#allocation2 + $0x70] sm:$0xff] %vm318_vm0, %v2760_v44  ;;  %v425_v45 = vpop.f32.mrb[13].mxu0  ;;  %2768 = vmatprep.subr.bf16.mxu1 %v3322_v53  ;;  %v3366_v3 = vld [vmem:[#allocation2 + $0x40] sm:$0xff]  ;;  %v961_v34 = vmul.f32 %v3262_v23, %v3380_v9  ;;  %v544_v44 = vmul.f32 %v3327_v54, %v3310_v49  ;;  %v956_v49 = vmul.f32 %v3262_v23, %v3314_v51 }
 0x10b   : > { %452 = vst.msk [vmem:[#allocation2 + $0x60] sm:$0xff] %vm318_vm0, %v425_v45  ;;  %v2761_v46 = vpop.f32.mrb[14].mxu0  ;;  %v3382_v10 = vld [vmem:[#allocation2 + $0x58] sm:$0xff]  ;;  %v959_v35 = vmul.f32 %v3262_v23, %v3366_v3 }
 0x10c   : > { %455 = vst.msk [vmem:[#allocation2 + $0x78] sm:$0xff] %vm318_vm0, %v2761_v46  ;;  %v428_v47 = vpop.f32.mrb[15].mxu0  ;;  %v3368_v4 = vld [vmem:[#allocation2 + $0x48] sm:$0xff]  ;;  %v3386_v11 = vpack.c.bf16 %v3382_v10, %v3380_v9  ;;  %v551_v40 = vmul.f32 %v3327_v54, %v3382_v10  ;;  %v568_v45 = vsel %vm511_vm1, %v544_v44, 0.0 }
 0x10d   : > { %453 = vst.msk [vmem:[#allocation2 + $0x68] sm:$0xff] %vm318_vm0, %v428_v47  ;;  %2769 = vmatpush3.bf16.msra.mxu1 %v3322_v53  ;;  %v3372_v5 = vpack.c.bf16 %v3368_v4, %v3366_v3  ;;  %v549_v42 = vmul.f32 %v3327_v54, %v3368_v4 }
 0x10e   : > { %4652 = vst [vmem:[#allocation8_spill] sm:$0xff] %v3386_v11  ;;  %v589_v41 = vsel %vm511_vm1, %v551_v40, 0.0 }
 0x10f   : > { %4651 = vst [vmem:[#allocation7_spill] sm:$0xff] %v3372_v5  ;;  %2770 = vmatprep.subr.bf16.mxu1 %v3372_v5  ;;  %v583_v43 = vsel %vm511_vm1, %v549_v42, 0.0 }
 0x111   : > { %2771 = vmatpush3.bf16.msra.mxu1 %v3372_v5  ;;  %v3426_v31 = vld [vmem:[#allocation2 + $0x70] sm:$0xff] }
 0x112   : > { %2772 = vmatprep.subr.bf16.mxu1 %v3386_v11  ;;  %v3417_v27 = vld [vmem:[#allocation2 + $0x60] sm:$0xff]  ;;  %v965_v46 = vmul.f32 %v3262_v23, %v3426_v31  ;;  %v554_v42 = vmul.f32 %v3327_v54, %v3426_v31 }
 0x113   : > { %v3428_v32 = vld [vmem:[#allocation2 + $0x78] sm:$0xff]  ;;  %v963_v47 = vmul.f32 %v3262_v23, %v3417_v27 }
 0x114   : > { %v3338_v56 = vld [vmem:[%s3335_s23 + $0x30] sm:$0xff]  ;;  %v3419_v28 = vld [vmem:[#allocation2 + $0x68] sm:$0xff]  ;;  %v3433_v33 = vpack.c.bf16 %v3428_v32, %v3426_v31 }
 0x115   : > { %v3345_v58 = vmul.f32 %v3333_v55, %v3338_v56  ;;  %2773 = vmatpush3.bf16.msra.mxu1 %v3386_v11  ;;  %v3423_v29 = vpack.c.bf16 %v3419_v28, %v3417_v27  ;;  %v3485_v6 = vld [vmem:[%s3335_s23 + $0x8] sm:$0xff] }
 0x116   : > { %4654 = vst [vmem:[#allocation10_spill] sm:$0xff] %v3433_v33 }
 0x117   : > { %4653 = vst [vmem:[#allocation9_spill] sm:$0xff] %v3423_v29  ;;  %2774 = vmatprep.subr.bf16.mxu1 %v3423_v29 }
 0x119   : > { %2775 = vmatpush3.bf16.msra.mxu1 %v3423_v29 }
 0x11a   : > { %2776 = vmatprep.subr.bf16.mxu1 %v3433_v33 }
 0x11d   : > { %2777 = vmatpush3.bf16.msra.mxu1 %v3433_v33 }
 0x11f   : > { %563 = vadd.xlane.f32.xlu0 %v562_v59  ;;  %v555_v59 = vmul.f32 %v3327_v54, %v3428_v32 }
 0x121   : > { %v601_v60 = vsel %vm511_vm1, %v555_v59, 0.0 }
 0x124   : > { %566 = vadd.xlane.f32.xlu1 %v565_v61  ;;  %v550_v61 = vmul.f32 %v3327_v54, %v3380_v9 }
 0x135   : > { %983 = vrot.lane.b32.xlu0 %v951_v62, %s3148_s14  ;;  %985 = vrot.lane.b32.xlu1 %v952_v63, %s3148_s14  ;;  %v586_v62 = vsel %vm511_vm1, %v550_v61, 0.0  ;;  %v548_v63 = vmul.f32 %v3327_v54, %v3366_v3 }
 0x139   : > { %1482 = vrot.lane.b32.xlu0 %v1450_v0, %s3147_s13  ;;  %v580_v0 = vsel %vm511_vm1, %v548_v63, 0.0 }
 0x13d   : > { %1973 = vrot.lane.b32.xlu0 %v1941_v1, %s3149_s15  ;;  %v3480_v1 = vld [vmem:[%s3335_s23] sm:$0xff] }
 0x13e   : > { %v879_v2 = vmul.f32 %v3256_v18, %v3480_v1 }
 0x159   : > { %560 = vadd.xlane.f32.xlu1 %v559_v7  ;;  %v880_v7 = vmul.f32 %v3256_v18, %v3485_v6 }
 0x15c   : > { %557 = vadd.xlane.f32.xlu0 %v556_v8  ;;  %v3491_v8 = vld [vmem:[%s3335_s23 + $0x10] sm:$0xff] }
 0x16a   : > { %995 = vrot.lane.b32.xlu1 %v957_v12, %s3148_s14  ;;  %v881_v12 = vmul.f32 %v3256_v18, %v3491_v8 }
 0x16e   : > { %991 = vrot.lane.b32.xlu1 %v955_v13, %s3148_s14  ;;  %v3497_v13 = vld [vmem:[%s3335_s23 + $0x18] sm:$0xff] }
 0x16f   : > { %v506_v63 = vmul.f32 %v3333_v55, %v3497_v13 }
 0x172   : > { %1488 = vrot.lane.b32.xlu0 %v1453_v14, %s3147_s13  ;;  %v962_v14 = vmul.f32 %v3262_v23, %v3382_v10 }
 0x176   : > { %1979 = vrot.lane.b32.xlu0 %v1944_v15, %s3149_s15  ;;  %v882_v15 = vmul.f32 %v3256_v18, %v3497_v13 }
 0x17a   : > { %1484 = vrot.lane.b32.xlu0 %v1451_v16, %s3147_s13  ;;  %v3505_v16 = vld [vmem:[%s3335_s23 + $0x20] sm:$0xff] }
 0x17b   : > { %v883_v19 = vmul.f32 %v3256_v18, %v3505_v16 }
 0x17e   : > { %1975 = vrot.lane.b32.xlu0 %v1942_v17, %s3149_s15  ;;  %v960_v17 = vmul.f32 %v3262_v23, %v3368_v4 }
 0x192   : > { %578 = vadd.xlane.f32.xlu1 %v577_v20  ;;  %v3514_v20 = vld [vmem:[%s3335_s23 + $0x28] sm:$0xff] }
 0x193   : > { %v884_v21 = vmul.f32 %v3256_v18, %v3514_v20 }
 0x196   : > { %572 = vadd.xlane.f32.xlu1 %v571_v22  ;;  %v3521_v22 = vld [vmem:[%s3335_s23 + $0x38] sm:$0xff] }
 0x197   : > { %v886_v25 = vmul.f32 %v3256_v18, %v3521_v22 }
 0x19d   : > { %575 = vadd.xlane.f32.xlu0 %v574_v26  ;;  %v3526_v26 = vpop.permute.xlu1 %987 }
 0x1a7   : > { %1003 = vrot.lane.b32.xlu1 %v961_v34, %s3148_s14  ;;  %v3529_v34 = vpop.permute.xlu0 %1375 }
 0x1ab   : > { %999 = vrot.lane.b32.xlu1 %v959_v35, %s3148_s14  ;;  %v990_v35 = vpop.permute.xlu1 %989 }
 0x1b3   : > { %1490 = vrot.lane.b32.xlu0 %v1454_v37, %s3147_s13  ;;  %v3531_v37 = vpop.permute.xlu0 %1866 }
 0x1b7   : > { %1981 = vrot.lane.b32.xlu0 %v1945_v38, %s3149_s15  ;;  %v3533_v38 = vpop.xlane.xlu1 %566  ;;  %v3535_v40 = vpop.permute.xlu0 %1486 }
 0x1cf   : > { %590 = vadd.xlane.f32.xlu1 %v589_v41  ;;  %v3537_v41 = vpop.permute.xlu1 %985 }
 0x1d3   : > { %584 = vadd.xlane.f32.xlu1 %v583_v43  ;;  %v3541_v43 = vpop.permute.xlu0 %1977 }
 0x1d6   : > { %569 = vadd.xlane.f32.xlu0 %v568_v45  ;;  %v598_v45 = vsel %vm511_vm1, %v554_v42, 0.0  ;;  %v966_v42 = vmul.f32 %v3262_v23, %v3428_v32 }
 0x1e4   : > { %1011 = vrot.lane.b32.xlu1 %v965_v46, %s3148_s14  ;;  %v552_v46 = vmul.f32 %v3327_v54, %v3417_v27 }
 0x1e6   : > { %v3543_v44 = vpop.xlane.xlu1 %560 }
 0x1e8   : > { %1007 = vrot.lane.b32.xlu1 %v963_v47, %s3148_s14  ;;  %v3548_v47 = vpop.xlane.xlu0 %563 }
 0x1ec   : > { %997 = vrot.lane.b32.xlu0 %v958_v57, %s3148_s14  ;;  %v996_v57 = vpop.permute.xlu1 %995  ;;  %v984_v59 = vpop.permute.xlu0 %983 }
 0x1f0   : > { %993 = vrot.lane.b32.xlu0 %v956_v49, %s3148_s14  ;;  %v592_v49 = vsel %vm511_vm1, %v552_v46, 0.0  ;;  %v3553_v61 = vpop.permute.xlu1 %991 }
 0x20c   : > { %602 = vadd.xlane.f32.xlu1 %v601_v60  ;;  %v505_v60 = vmul.f32 %v3333_v55, %v3491_v8 }
 0x20f   : > { %587 = vadd.xlane.f32.xlu0 %v586_v62  ;;  %v518_v62 = vsel %vm511_vm1, %v505_v60, 0.0  ;;  %v885_v60 = vmul.f32 %v3256_v18, %v3338_v56  ;;  %v1040_v18 = vsel %vm511_vm1, %v990_v35, 0.0 }
 0x213   : > { %581 = vadd.xlane.f32.xlu0 %v580_v0  ;;  %v3558_v0 = vpop.permute.xlu0 %1482 }
 0x21d   : > { %895 = vrot.lane.b32.xlu1 %v879_v2, %s3148_s14 }
 0x21f   : > { %v3560_v2 = vpop.xlane.xlu1 %578 }
 0x221   : > { %897 = vrot.lane.b32.xlu1 %v880_v7, %s3148_s14  ;;  %v521_v7 = vsel %vm511_vm1, %v506_v63, 0.0 }
 0x225   : > { %899 = vrot.lane.b32.xlu1 %v881_v12, %s3148_s14  ;;  %v508_v12 = vmul.f32 %v3333_v55, %v3514_v20 }
 0x229   : > { %1005 = vrot.lane.b32.xlu0 %v962_v14, %s3148_s14  ;;  %901 = vrot.lane.b32.xlu1 %v882_v15, %s3148_s14  ;;  %v3565_v14 = vpop.permute.xlu0 %1973  ;;  %v3567_v15 = vpop.xlane.xlu1 %572 }
 0x22d   : > { %1001 = vrot.lane.b32.xlu0 %v960_v17, %s3148_s14  ;;  %903 = vrot.lane.b32.xlu1 %v883_v19, %s3148_s14  ;;  %v527_v17 = vsel %vm511_vm1, %v508_v12, 0.0  ;;  %v510_v19 = vmul.f32 %v3333_v55, %v3521_v22  ;;  %v1004_v46 = vpop.permute.xlu1 %1003 }
 0x231   : > { %905 = vrot.lane.b32.xlu1 %v884_v21, %s3148_s14  ;;  %v3572_v21 = vpop.xlane.xlu0 %557  ;;  %v1000_v63 = vpop.permute.xlu1 %999 }
 0x235   : > { %909 = vrot.lane.b32.xlu1 %v886_v25, %s3148_s14  ;;  %v533_v25 = vsel %vm511_vm1, %v510_v19, 0.0  ;;  %v1049_v19 = vsel %vm511_vm1, %v996_v57, 0.0 }
 0x24c   : > { %599 = vadd.xlane.f32.xlu0 %v598_v45  ;;  %v553_v45 = vmul.f32 %v3327_v54, %v3419_v28  ;;  %v964_v54 = vmul.f32 %v3262_v23, %v3419_v28 }
 0x250   : > { %593 = vadd.xlane.f32.xlu0 %v592_v49  ;;  %v595_v49 = vsel %vm511_vm1, %v553_v45, 0.0 }
 0x259   : > { %519 = vadd.xlane.f32.xlu1 %v518_v62  ;;  %v3583_v62 = vpop.permute.xlu0 %1488 }
 0x25d   : > { %522 = vadd.xlane.f32.xlu1 %v521_v7  ;;  %v1031_v7 = vsel %vm511_vm1, %v984_v59, 0.0  ;;  %v3590_v12 = vpop.permute.xlu0 %1979  ;;  %v1061_v59 = vsel %vm511_vm1, %v1004_v46, 0.0  ;;  %v503_v46 = vmul.f32 %v3333_v55, %v3480_v1 }
 0x261   : > { %528 = vadd.xlane.f32.xlu1 %v527_v17  ;;  %v3592_v17 = vpop.xlane.xlu1 %590 }
 0x265   : > { %534 = vadd.xlane.f32.xlu1 %v533_v25  ;;  %v3596_v25 = vpop.permute.xlu0 %1484 }
 0x266   : > { %1013 = vrot.lane.b32.xlu0 %v966_v42, %s3148_s14  ;;  %v3598_v42 = vpop.xlane.xlu1 %584 }
 0x269   : > { %596 = vadd.xlane.f32.xlu1 %v595_v49  ;;  %v3601_v23 = vpop.permute.xlu0 %1975  ;;  %v1055_v49 = vsel %vm511_vm1, %v1000_v63, 0.0  ;;  %v504_v63 = vmul.f32 %v3333_v55, %v3485_v6 }
 0x26a   : > { %907 = vrot.lane.b32.xlu0 %v885_v60, %s3148_s14  ;;  %v1012_v45 = vpop.permute.xlu1 %1011 }
 0x26b   : > { %v1073_v35 = vsel %vm511_vm1, %v1012_v45, 0.0  ;;  %v515_v45 = vsel %vm511_vm1, %v504_v63, 0.0 }
 0x26d   : > { %1032 = vadd.xlane.f32.xlu1 %v1031_v7  ;;  %v3604_v60 = vpop.xlane.xlu0 %575 }
 0x26e   : > { %1009 = vrot.lane.b32.xlu0 %v964_v54, %s3148_s14  ;;  %v1008_v7 = vpop.permute.xlu1 %1007 }
 0x26f   : > { %v1067_v57 = vsel %vm511_vm1, %v1008_v7, 0.0 }
 0x271   : > { %1041 = vadd.xlane.f32.xlu1 %v1040_v18  ;;  %v3608_v54 = vpop.permute.xlu0 %1490 }
 0x275   : > { %1050 = vadd.xlane.f32.xlu1 %v1049_v19  ;;  %v3612_v18 = vpop.permute.xlu0 %1981  ;;  %v512_v19 = vsel %vm511_vm1, %v503_v46, 0.0 }
 0x279   : > { %1062 = vadd.xlane.f32.xlu1 %v1061_v59  ;;  %v3617_v59 = vpop.xlane.xlu0 %569 }
 0x27d   : > { %1056 = vadd.xlane.f32.xlu1 %v1055_v49  ;;  %v507_v49 = vmul.f32 %v3333_v55, %v3505_v16  ;;  %v998_v7 = vpop.permute.xlu0 %997 }
 0x281   : > { %1074 = vadd.xlane.f32.xlu1 %v1073_v35  ;;  %v524_v35 = vsel %vm511_vm1, %v507_v49, 0.0  ;;  %v994_v33 = vpop.permute.xlu0 %993 }
 0x285   : > { %1068 = vadd.xlane.f32.xlu1 %v1067_v57  ;;  %v530_v57 = vsel %vm511_vm1, %v3345_v58, 0.0 }
 0x28d   : > { %513 = vadd.xlane.f32.xlu0 %v512_v19  ;;  %v1037_v19 = vsel %vm511_vm1, %v3526_v26, 0.0 }
 0x291   : > { %516 = vadd.xlane.f32.xlu0 %v515_v45  ;;  %v1034_v45 = vsel %vm511_vm1, %v3537_v41, 0.0  ;;  %v1046_v41 = vsel %vm511_vm1, %v994_v33, 0.0 }
 0x295   : > { %525 = vadd.xlane.f32.xlu0 %v524_v35  ;;  %v1043_v35 = vsel %vm511_vm1, %v3553_v61, 0.0 }
 0x299   : > { %v3625_v46 = vpop.xlane.xlu1 %602  ;;  %531 = vadd.xlane.f32.xlu0 %v530_v57 }
 0x29c   : > { %v3630_v55 = vpop.xlane.xlu0 %587 }
 0x29d   : > { %v896_v11 = vpop.permute.xlu1 %895  ;;  %1038 = vadd.xlane.f32.xlu0 %v1037_v19  ;;  %v1052_v19 = vsel %vm511_vm1, %v998_v7, 0.0 }
 0x29e   : > { %v919_v63 = vsel %vm511_vm1, %v896_v11, 0.0 }
 0x29f   : > { %920 = vadd.xlane.f32.xlu1 %v919_v63 }
 0x2a0   : > { %v582_v57 = vpop.xlane.xlu0 %581 }
 0x2a1   : > { %v898_v49 = vpop.permute.xlu1 %897  ;;  %1035 = vadd.xlane.f32.xlu0 %v1034_v45 }
 0x2a2   : > { %v922_v58 = vsel %vm511_vm1, %v898_v49, 0.0 }
 0x2a3   : > { %923 = vadd.xlane.f32.xlu1 %v922_v58 }
 0x2a4   : > { %v1006_v39 = vpop.permute.xlu0 %1005 }
 0x2a5   : > { %v900_v26 = vpop.permute.xlu1 %899  ;;  %1044 = vadd.xlane.f32.xlu0 %v1043_v35  ;;  %v1064_v61 = vsel %vm511_vm1, %v1006_v39, 0.0 }
 0x2a6   : > { %v925_v39 = vsel %vm511_vm1, %v900_v26, 0.0  ;;  %v1956_v26 = vmul.f32 %v3269_v30, %v3428_v32 }
 0x2a8   : > { %v1002_v58 = vpop.permute.xlu0 %1001 }
 0x2a9   : > { %v902_v11 = vpop.permute.xlu1 %901  ;;  %1053 = vadd.xlane.f32.xlu0 %v1052_v19  ;;  %v1058_v35 = vsel %vm511_vm1, %v1002_v58, 0.0 }
 0x2aa   : > { %v928_v63 = vsel %vm511_vm1, %v902_v11, 0.0 }
 0x2ab   : > { %929 = vadd.xlane.f32.xlu1 %v928_v63 }
 0x2ad   : > { %v904_v45 = vpop.permute.xlu1 %903  ;;  %1047 = vadd.xlane.f32.xlu0 %v1046_v41 }
 0x2ae   : > { %v931_v49 = vsel %vm511_vm1, %v904_v45, 0.0 }
 0x2af   : > { %932 = vadd.xlane.f32.xlu1 %v931_v49 }
 0x2b1   : > { %v906_v29 = vpop.permute.xlu1 %905  ;;  %1065 = vadd.xlane.f32.xlu0 %v1064_v61 }
 0x2b2   : > { %v934_v7 = vsel %vm511_vm1, %v906_v29, 0.0 }
 0x2b3   : > { %935 = vadd.xlane.f32.xlu1 %v934_v7  ;;  %v1951_v7 = vmul.f32 %v3269_v30, %v3380_v9 }
 0x2b5   : > { %1059 = vadd.xlane.f32.xlu0 %v1058_v35  ;;  %v910_v49 = vpop.permute.xlu1 %909  ;;  %v1955_v35 = vmul.f32 %v3269_v30, %v3426_v31 }
 0x2b6   : > { %v940_v29 = vsel %vm511_vm1, %v910_v49, 0.0  ;;  %v1463_v49 = vmul.f32 %v3264_v24, %v3419_v28 }
 0x2d9   : > { %v600_v19 = vpop.xlane.xlu0 %599 }
 0x2dd   : > { %v594_v11 = vpop.xlane.xlu0 %593 }
 0x2e1   : > { %v1014_v63 = vpop.permute.xlu0 %1013 }
 0x2e2   : > { %v1076_v33 = vsel %vm511_vm1, %v1014_v63, 0.0  ;;  %v2021_v63 = vsel %vm511_vm1, %v3565_v14, 0.0 }
 0x2e3   : > { %1077 = vadd.xlane.f32.xlu0 %v1076_v33  ;;  %v2027_v33 = vsel %vm511_vm1, %v3541_v43, 0.0  ;;  %v1379_v43 = vmul.f32 %v3529_v34, %v3485_v6 }
 0x2e5   : > { %v908_v41 = vpop.permute.xlu0 %907 }
 0x2e6   : > { %v937_v45 = vsel %vm511_vm1, %v908_v41, 0.0  ;;  %v1952_v41 = vmul.f32 %v3269_v30, %v3382_v10 }
 0x2e7   : > { %938 = vadd.xlane.f32.xlu1 %v937_v45  ;;  %926 = vadd.xlane.f32.xlu0 %v925_v39  ;;  %v1462_v45 = vmul.f32 %v3264_v24, %v3417_v27  ;;  %v1953_v39 = vmul.f32 %v3269_v30, %v3417_v27  ;;  %v1465_v27 = vmul.f32 %v3264_v24, %v3428_v32 }
 0x2e9   : > { %v1010_v61 = vpop.permute.xlu0 %1009 }
 0x2ea   : > { %v1070_v58 = vsel %vm511_vm1, %v1010_v61, 0.0  ;;  %v1954_v61 = vmul.f32 %v3269_v30, %v3419_v28 }
 0x2eb   : > { %941 = vadd.xlane.f32.xlu1 %v940_v29  ;;  %1071 = vadd.xlane.f32.xlu0 %v1070_v58  ;;  %v1464_v58 = vmul.f32 %v3264_v24, %v3426_v31  ;;  %v1530_v31 = vsel %vm511_vm1, %v3558_v0, 0.0 }
 0x2fc   : > { %1993 = vrot.lane.b32.xlu1 %v1951_v7, %s3149_s15 }
 0x300   : > { %2001 = vrot.lane.b32.xlu1 %v1955_v35, %s3149_s15 }
 0x304   : > { %2003 = vrot.lane.b32.xlu1 %v1956_v26, %s3149_s15 }
 0x318   : > { %604 = vxpose.xlu0.b32.start [1/16] (narrow) %v3572_v21, 8  ;;  %v2030_v21 = vsel %vm511_vm1, %v3590_v12, 0.0  ;;  %v1455_v12 = vmul.f32 %v3264_v24, %v3314_v51 }
 0x31c   : > { %605 = vxpose.xlu0.b32.cont [2/16] (narrow) %v3543_v44, 8  ;;  %v3671_v44 = vpop.xlane.xlu1 %519 }
 0x320   : > { %606 = vxpose.xlu0.b32.cont [3/16] (narrow) %v3548_v47, 8 }
 0x324   : > { %607 = vxpose.xlu0.b32.cont [4/16] (narrow) %v3533_v38, 8  ;;  %v3674_v38 = vpop.xlane.xlu1 %522 }
 0x328   : > { %2022 = vadd.xlane.f32.xlu1 %v2021_v63  ;;  %608 = vxpose.xlu0.b32.cont [5/16] (narrow) %v3617_v59, 8  ;;  %v3677_v47 = vpop.xlane.xlu1 %528  ;;  %v1458_v59 = vmul.f32 %v3264_v24, %v3366_v3 }
 0x32c   : > { %2028 = vadd.xlane.f32.xlu1 %v2027_v33  ;;  %609 = vxpose.xlu0.b32.cont [6/16] (narrow) %v3567_v15, 8  ;;  %v3684_v14 = vpop.xlane.xlu1 %534  ;;  %v1542_v15 = vsel %vm511_vm1, %v3608_v54, 0.0  ;;  %v1457_v54 = vmul.f32 %v3264_v24, %v3312_v50 }
 0x330   : > { %2031 = vadd.xlane.f32.xlu1 %v2030_v21  ;;  %610 = vxpose.xlu0.b32.cont [7/16] (narrow) %v3604_v60, 8  ;;  %v1947_v60 = vmul.f32 %v3269_v30, %v3308_v48  ;;  %v2024_v21 = vsel %vm511_vm1, %v3601_v23, 0.0  ;;  %v1378_v23 = vmul.f32 %v3529_v34, %v3480_v1 }
 0x334   : > { %611 = vxpose.xlu0.b32.cont [8/16] (narrow) %v3560_v2, 8  ;;  %v597_v2 = vpop.xlane.xlu1 %596 }
 0x338   : > { %612 = vxpose.xlu0.b32.cont [9/16] (narrow) %v582_v57, 8 }
 0x33c   : > { %613 = vxpose.xlu0.b32.cont [10/16] (narrow) %v3598_v42, 8  ;;  %v1456_v42 = vmul.f32 %v3264_v24, %v3308_v48  ;;  %v1949_v48 = vmul.f32 %v3269_v30, %v3366_v3 }
 0x340   : > { %614 = vxpose.xlu0.b32.cont [11/16] (narrow) %v3630_v55, 8  ;;  %v1459_v55 = vmul.f32 %v3264_v24, %v3368_v4 }
 0x341   : > { %1396 = vrot.lane.b32.xlu1 %v1379_v43, %s3147_s13 }
 0x344   : > { %615 = vxpose.xlu0.b32.cont [12/16] (narrow) %v3592_v17, 8  ;;  %v1946_v17 = vmul.f32 %v3269_v30, %v3314_v51  ;;  %v1948_v51 = vmul.f32 %v3269_v30, %v3312_v50  ;;  %v1950_v50 = vmul.f32 %v3269_v30, %v3368_v4 }
 0x348   : > { %616 = vxpose.xlu0.b32.cont [13/16] (narrow) %v594_v11, 8  ;;  %v1461_v11 = vmul.f32 %v3264_v24, %v3382_v10 }
 0x34c   : > { %617 = vxpose.xlu0.b32.cont [14/16] (narrow) %v597_v2, 8  ;;  %v1536_v2 = vsel %vm511_vm1, %v3535_v40, 0.0  ;;  %v1380_v40 = vmul.f32 %v3529_v34, %v3491_v8 }
 0x350   : > { %618 = vxpose.xlu0.b32.cont [15/16] (narrow) %v600_v19, 8  ;;  %v1460_v19 = vmul.f32 %v3264_v24, %v3380_v9  ;;  %v1533_v24 = vsel %vm511_vm1, %v3596_v25, 0.0  ;;  %v1871_v25 = vmul.f32 %v3531_v37, %v3491_v8  ;;  %v1869_v8 = vmul.f32 %v3531_v37, %v3480_v1  ;;  %v2660_v1 = vld [vmem:[%s3817_s28] sm:$0xff]  }
 0x354   : > { %619 = vxpose.xlu0.b32.end [16/16] (narrow) %v3625_v46, 8  ;;  %v3713_v46 = vpop.xlane.xlu0 %513 }
 0x358   : > { %v3720_v57 = vpop.xlane.xlu0 %516 }
 0x35c   : > { %v3726_v3 = vpop.xlane.xlu0 %525 }
 0x360   : > { %v3733_v4 = vpop.xlane.xlu0 %531 }
 0x364   : > { %v3739_v9 = vpop.xlane.xlu0 %1038 }
 0x365   : > { %1543 = vadd.xlane.f32.xlu1 %v1542_v15  ;;  %v1539_v15 = vsel %vm511_vm1, %v3583_v62, 0.0  ;;  %v1381_v62 = vmul.f32 %v3529_v34, %v3497_v13 }
 0x368   : > { %v3746_v10 = vpop.xlane.xlu0 %1035 }
 0x36c   : > { %v3752_v29 = vpop.xlane.xlu0 %1044 }
 0x370   : > { %v3759_v7 = vpop.xlane.xlu0 %1053 }
 0x374   : > { %v3762_v35 = vpop.xlane.xlu0 %1047 }
 0x378   : > { %v3764_v26 = vpop.xlane.xlu0 %1065 }
 0x37c   : > { %v3766_v30 = vpop.xlane.xlu0 %1059 }
 0x37d   : > { %1492 = vrot.lane.b32.xlu0 %v1455_v12, %s3147_s13  ;;  %v636_v12 = vlaneseq }
 0x380   : > { %v3768_v28 = vpop.xlane.xlu0 %1077 }
 0x381   : > { %1983 = vrot.lane.b32.xlu0 %v1946_v17, %s3149_s15  ;;  %v637_v17 = vshrl.u32 %v636_v12, 7 }
 0x384   : > { %v3770_v63 = vpop.xlane.xlu0 %926 }
 0x385   : > { %1494 = vrot.lane.b32.xlu0 %v1456_v42, %s3147_s13  ;;  %v3798_v42 = vsub.s32 0, %v637_v17  ;;  %v2677_v17 = vld [vmem:[%s3817_s28 + $0x18] sm:$0xff]  }
 0x388   : > { %v3774_v33 = vpop.xlane.xlu0 %1071 }
 0x389   : > { %1985 = vrot.lane.b32.xlu0 %v1947_v60, %s3149_s15 }
 0x38d   : > { %1496 = vrot.lane.b32.xlu0 %v1457_v54, %s3147_s13  ;;  %v1870_v54 = vmul.f32 %v3531_v37, %v3485_v6 }
 0x391   : > { %1987 = vrot.lane.b32.xlu0 %v1948_v51, %s3149_s15 }
 0x395   : > { %1498 = vrot.lane.b32.xlu0 %v1458_v59, %s3147_s13 }
 0x398   : > { %v620_v32 = vpop.trf.xlu0 }
 0x399   : > { %1989 = vrot.lane.b32.xlu0 %v1949_v48, %s3149_s15  ;;  %v639_v60 = vrot.slane %v620_v32, %v3798_v42  ;;  %v2676_v32 = vld [vmem:[%s3817_s28 + $0x10] sm:$0xff]  }
 0x39b   : > { %v640_v51 = vadd.f32 %v639_v60, %v3713_v46  ;;  %v641_v48 = vadd.f32 %v639_v60, %v3720_v57  ;;  %v642_v46 = vadd.f32 %v639_v60, %v3671_v44 }
 0x39d   : > { %1500 = vrot.lane.b32.xlu0 %v1459_v55, %s3147_s13  ;;  %v656_v59 = vmul.f32 0.2, %v640_v51  ;;  %vm648_vm2 = vcmp.gt.f32.partialorder %v640_v51, 0.0  ;;  %v3821_v55 = vunpack.c.l.bf16 %v2660_v1  ;;  %vm649_vm3 = vcmp.gt.f32.partialorder %v641_v48, 0.0 }
 0x39e   : > { %vm650_vm4 = vcmp.gt.f32.partialorder %v642_v46, 0.0 }
 0x39f   : > { %v664_v6 = vsel %vm648_vm2, %v640_v51, %v656_v59  ;;  %v3871_v59 = vunpack.c.l.bf16 %v2677_v17 }
 0x3a1   : > { %1991 = vrot.lane.b32.xlu0 %v1950_v50, %s3149_s15  ;;  %v657_v50 = vmul.f32 0.2, %v641_v48 }
 0x3a5   : > { %1502 = vrot.lane.b32.xlu0 %v1460_v19, %s3147_s13  ;;  %v3825_v19 = vadd.f32 %v3821_v55, %v664_v6 }
 0x3a9   : > { %1504 = vrot.lane.b32.xlu0 %v1461_v11, %s3147_s13  ;;  %v3827_v11 = vunpack.c.h.bf16 %v2660_v1 }
 0x3ad   : > { %1995 = vrot.lane.b32.xlu0 %v1952_v41, %s3149_s15  ;;  %v665_v41 = vsel %vm649_vm3, %v641_v48, %v657_v50  ;;  %v3877_v50 = vunpack.c.h.bf16 %v2677_v17  ;;  %v1383_v17 = vmul.f32 %v3529_v34, %v3514_v20 }
 0x3ae   : > { %v3833_v57 = vadd.f32 %v3827_v11, %v665_v41 }
 0x3af   : > { %4657 = vst [vmem:[#allocation13_spill] sm:$0xff] %v3877_v50 }
 0x3b1   : > { %1506 = vrot.lane.b32.xlu0 %v1462_v45, %s3147_s13  ;;  %v2675_v45 = vld [vmem:[%s3817_s28 + $0x8] sm:$0xff]  }
 0x3b5   : > { %1997 = vrot.lane.b32.xlu0 %v1953_v39, %s3149_s15  ;;  %v658_v39 = vmul.f32 0.2, %v642_v46 }
 0x3b7   : > { %v666_v44 = vsel %vm650_vm4, %v642_v46, %v658_v39 }
 0x3b9   : > { %1508 = vrot.lane.b32.xlu0 %v1463_v49, %s3147_s13  ;;  %v643_v49 = vadd.f32 %v639_v60, %v3674_v38 }
 0x3bb   : > { %vm651_vm5 = vcmp.gt.f32.partialorder %v643_v49, 0.0 }
 0x3bd   : > { %1999 = vrot.lane.b32.xlu0 %v1954_v61, %s3149_s15  ;;  %v3835_v61 = vunpack.c.l.bf16 %v2675_v45 }
 0x3c1   : > { %1510 = vrot.lane.b32.xlu0 %v1464_v58, %s3147_s13  ;;  %v659_v58 = vmul.f32 0.2, %v643_v49 }
 0x3c3   : > { %v667_v38 = vsel %vm651_vm5, %v643_v49, %v659_v58 }
 0x3c5   : > { %1512 = vrot.lane.b32.xlu0 %v1465_v27, %s3147_s13  ;;  %v644_v27 = vadd.f32 %v639_v60, %v3726_v3  ;;  %v3850_v3 = vunpack.c.l.bf16 %v2676_v32 }
 0x3c7   : > { %vm652_vm6 = vcmp.gt.f32.partialorder %v644_v27, 0.0 }
 0x3e4   : > { %1531 = vadd.xlane.f32.xlu0 %v1530_v31  ;;  %v3840_v31 = vadd.f32 %v3835_v61, %v666_v44 }
 0x3e8   : > { %1534 = vadd.xlane.f32.xlu0 %v1533_v24  ;;  %v3842_v24 = vunpack.c.h.bf16 %v2675_v45 }
 0x3ea   : > { %4655 = vst [vmem:[#allocation11_spill] sm:$0xff] %v3842_v24 }
 0x3ec   : > { %2025 = vadd.xlane.f32.xlu0 %v2024_v21  ;;  %v660_v21 = vmul.f32 0.2, %v644_v27 }
 0x3ef   : > { %v1493_v43 = vpop.permute.xlu0 %1492 }
 0x3f0   : > { %1537 = vadd.xlane.f32.xlu0 %v1536_v2  ;;  %v1545_v0 = vsel %vm511_vm1, %v1493_v43, 0.0  ;;  %v645_v43 = vadd.f32 %v639_v60, %v3677_v47  ;;  %v3848_v2 = vadd.f32 %v3842_v24, %v667_v38  ;;  %v3859_v47 = vunpack.c.h.bf16 %v2676_v32 }
 0x3f1   : > { %1546 = vadd.xlane.f32.xlu1 %v1545_v0  ;;  %v3852_v0 = vpop.xlane.xlu1 %1032  ;;  %v1872_v32 = vmul.f32 %v3531_v37, %v3497_v13 }
 0x3f2   : > { %vm653_vm7 = vcmp.gt.f32.partialorder %v645_v43, 0.0  ;;  %4656 = vst [vmem:[#allocation12_spill] sm:$0xff] %v3859_v47 }
 0x3f4   : > { %1540 = vadd.xlane.f32.xlu0 %v1539_v15  ;;  %v668_v15 = vsel %vm652_vm6, %v644_v27, %v660_v21 }
 0x3f5   : > { %v3857_v12 = vadd.f32 %v3850_v3, %v668_v15  ;;  %v3864_v51 = vpop.xlane.xlu1 %1041 }
 0x3f9   : > { %v3879_v46 = vpop.xlane.xlu1 %1050 }
 0x3fd   : > { %v3886_v39 = vpop.xlane.xlu1 %1062 }
 0x401   : > { %v3889_v58 = vpop.xlane.xlu1 %1056 }
 0x402   : > { %1889 = vrot.lane.b32.xlu1 %v1871_v25, %s3149_s15  ;;  %v661_v25 = vmul.f32 0.2, %v645_v43 }
 0x40a   : > { %1394 = vrot.lane.b32.xlu0 %v1378_v23, %s3147_s13  ;;  %v646_v23 = vadd.f32 %v639_v60, %v3733_v4  ;;  %v2033_v4 = vsel %vm511_vm1, %v3612_v18, 0.0 }
 0x40c   : > { %vm654_vm8 = vcmp.gt.f32.partialorder %v646_v23, 0.0 }
 0x40e   : > { %1398 = vrot.lane.b32.xlu0 %v1380_v40, %s3147_s13  ;;  %v669_v40 = vsel %vm653_vm7, %v645_v43, %v661_v25  ;;  %v3895_v43 = vpop.xlane.xlu1 %1074 }
 0x40f   : > { %v3869_v1 = vadd.f32 %v3859_v47, %v669_v40 }
 0x412   : > { %1400 = vrot.lane.b32.xlu0 %v1381_v62, %s3147_s13  ;;  %v662_v62 = vmul.f32 0.2, %v646_v23  ;;  %v3899_v25 = vpop.xlane.xlu1 %1068 }
 0x414   : > { %v670_v48 = vsel %vm654_vm8, %v646_v23, %v662_v62 }
 0x416   : > { %1885 = vrot.lane.b32.xlu0 %v1869_v8, %s3149_s15  ;;  %v647_v8 = vadd.f32 %v639_v60, %v3684_v14  ;;  %v3875_v60 = vadd.f32 %v3871_v59, %v670_v48  ;;  %v3901_v23 = vpop.xlane.xlu1 %920 }
 0x418   : > { %v663_v6 = vmul.f32 0.2, %v647_v8  ;;  %vm655_vm9 = vcmp.gt.f32.partialorder %v647_v8, 0.0 }
 0x41a   : > { %1887 = vrot.lane.b32.xlu0 %v1870_v54, %s3149_s15  ;;  %v1984_v54 = vpop.permute.xlu0 %1983  ;;  %v671_v18 = vsel %vm655_vm9, %v647_v8, %v663_v6  ;;  %v3903_v40 = vpop.xlane.xlu1 %923 }
 0x41b   : > { %v3883_v41 = vadd.f32 %v3877_v50, %v671_v18  ;;  %v2036_v49 = vsel %vm511_vm1, %v1984_v54, 0.0 }
 0x41e   : > { %v1495_v14 = vpop.permute.xlu0 %1494  ;;  %v3907_v62 = vpop.xlane.xlu1 %929 }
 0x41f   : > { %v1548_v8 = vsel %vm511_vm1, %v1495_v14, 0.0 }
 0x422   : > { %v1986_v45 = vpop.permute.xlu0 %1985  ;;  %v3910_v13 = vpop.xlane.xlu1 %932 }
 0x423   : > { %v2039_v27 = vsel %vm511_vm1, %v1986_v45, 0.0 }
 0x426   : > { %680 = vmax.xlane.f32.xlu1 %v3825_v19  ;;  %v1497_v44 = vpop.permute.xlu0 %1496  ;;  %v3913_v54 = vpop.xlane.xlu1 %935 }
 0x427   : > { %v1551_v38 = vsel %vm511_vm1, %v1497_v44, 0.0 }
 0x42a   : > { %682 = vmax.xlane.f32.xlu1 %v3833_v57  ;;  %v1988_v21 = vpop.permute.xlu0 %1987 }
 0x42b   : > { %v2042_v15 = vsel %vm511_vm1, %v1988_v21, 0.0  ;;  %v1385_v21 = vmul.f32 %v3529_v34, %v3521_v22 }
 0x42e   : > { %684 = vmax.xlane.f32.xlu1 %v3840_v31  ;;  %v1499_v6 = vpop.permute.xlu0 %1498 }
 0x42f   : > { %v1554_v14 = vsel %vm511_vm1, %v1499_v6, 0.0  ;;  %v1874_v6 = vmul.f32 %v3531_v37, %v3514_v20 }
 0x432   : > { %686 = vmax.xlane.f32.xlu1 %v3848_v2  ;;  %v1990_v45 = vpop.permute.xlu0 %1989 }
 0x433   : > { %v2045_v20 = vsel %vm511_vm1, %v1990_v45, 0.0 }
 0x436   : > { %688 = vmax.xlane.f32.xlu1 %v3857_v12 }
 0x439   : > { %2034 = vadd.xlane.f32.xlu0 %v2033_v4  ;;  %v3915_v4 = vpop.xlane.xlu1 %938 }
 0x43a   : > { %690 = vmax.xlane.f32.xlu1 %v3869_v1 }
 0x43d   : > { %v3917_v48 = vpop.xlane.xlu1 %941 }
 0x43e   : > { %692 = vmax.xlane.f32.xlu1 %v3875_v60 }
 0x441   : > { %v3919_v18 = vpop.permute.xlu1 %1993 }
 0x442   : > { %694 = vmax.xlane.f32.xlu1 %v3883_v41 }
 0x445   : > { %v3924_v44 = vpop.permute.xlu1 %2001 }
 0x446   : > { %2037 = vadd.xlane.f32.xlu1 %v2036_v49  ;;  %v1382_v49 = vmul.f32 %v3529_v34, %v3505_v16 }
 0x44a   : > { %2040 = vadd.xlane.f32.xlu1 %v2039_v27  ;;  %v1384_v27 = vmul.f32 %v3529_v34, %v3338_v56  ;;  %v1875_v34 = vmul.f32 %v3531_v37, %v3338_v56 }
 0x44e   : > { %1552 = vadd.xlane.f32.xlu1 %v1551_v38  ;;  %v1501_v38 = vpop.permute.xlu0 %1500 }
 0x44f   : > { %1891 = vrot.lane.b32.xlu0 %v1872_v32, %s3149_s15  ;;  %v1557_v32 = vsel %vm511_vm1, %v1501_v38, 0.0 }
 0x452   : > { %2043 = vadd.xlane.f32.xlu1 %v2042_v15  ;;  %v3933_v15 = vpop.permute.xlu1 %2003  ;;  %v1992_v36 = vpop.permute.xlu0 %1991 }
 0x463   : > { %1404 = vrot.lane.b32.xlu1 %v1383_v17, %s3147_s13  ;;  %v1873_v17 = vmul.f32 %v3531_v37, %v3505_v16 }
 0x46e   : > { %1549 = vadd.xlane.f32.xlu0 %v1548_v8  ;;  %v3938_v8 = vpop.xlane.xlu1 %2022 }
 0x484   : > { %1402 = vrot.lane.b32.xlu0 %v1382_v49, %s3147_s13  ;;  %v3944_v49 = vpop.xlane.xlu1 %2028 }
 0x487   : > { %1555 = vadd.xlane.f32.xlu1 %v1554_v14 }
 0x488   : > { %1406 = vrot.lane.b32.xlu0 %v1384_v27, %s3147_s13  ;;  %v3948_v14 = vpop.xlane.xlu1 %2031 }
 0x48b   : > { %1558 = vadd.xlane.f32.xlu1 %v1557_v32 }
 0x48c   : > { %1408 = vrot.lane.b32.xlu0 %v1385_v21, %s3147_s13  ;;  %v3951_v27 = vpop.permute.xlu1 %1396 }
 0x490   : > { %1893 = vrot.lane.b32.xlu0 %v1873_v17, %s3149_s15  ;;  %v3953_v16 = vpop.xlane.xlu1 %1543 }
 0x494   : > { %1895 = vrot.lane.b32.xlu0 %v1874_v6, %s3149_s15  ;;  %v3955_v38 = vpop.xlane.xlu1 %1546 }
 0x498   : > { %v3957_v32 = vpop.permute.xlu1 %1889 }
 0x49c   : > { %1897 = vrot.lane.b32.xlu1 %v1875_v34, %s3149_s15 }
 0x4b3   : > { %2046 = vadd.xlane.f32.xlu0 %v2045_v20  ;;  %v681_v21 = vpop.xlane.xlu1 %680 }
 0x4b4   : > { %v696_v17 = vsub.f32 %v3825_v19, %v681_v21  ;;  %v1503_v21 = vpop.permute.xlu0 %1502 }
 0x4b6   : > { %v704_v6 = vmul.f32 1.442695, %v696_v17 }
 0x4b7   : > { %v683_v56 = vpop.xlane.xlu1 %682 }
 0x4b8   : > { %2944 = vpow2.f32 %v704_v6  ;;  %v697_v5 = vsub.f32 %v3833_v57, %v683_v56 }
 0x4ba   : > { %v706_v34 = vmul.f32 1.442695, %v697_v5 }
 0x4bb   : > { %v685_v53 = vpop.xlane.xlu1 %684 }
 0x4bc   : > { %2946 = vpow2.f32 %v706_v34  ;;  %v698_v52 = vsub.f32 %v3840_v31, %v685_v53  ;;  %v1876_v53 = vmul.f32 %v3531_v37, %v3521_v22 }
 0x4be   : > { %v708_v50 = vmul.f32 1.442695, %v698_v52 }
 0x4bf   : > { %v687_v47 = vpop.xlane.xlu1 %686 }
 0x4c0   : > { %2948 = vpow2.f32 %v708_v50  ;;  %v699_v45 = vsub.f32 %v3848_v2, %v687_v47  ;;  %v1505_v47 = vpop.permute.xlu0 %1504 }
 0x4c2   : > { %v3964_v20 = vpop.eup %2944  ;;  %v710_v24 = vmul.f32 1.442695, %v699_v45 }
 0x4c3   : > { %720 = vadd.xlane.f32.xlu1 %v3964_v20  ;;  %v689_v19 = vpop.xlane.xlu1 %688 }
 0x4c4   : > { %2950 = vpow2.f32 %v710_v24  ;;  %v700_v5 = vsub.f32 %v3857_v12, %v689_v19  ;;  %v1996_v37 = vpop.permute.xlu0 %1995 }
 0x4c6   : > { %v3968_v57 = vpop.eup %2946  ;;  %v712_v17 = vmul.f32 1.442695, %v700_v5 }
 0x4c7   : > { %722 = vadd.xlane.f32.xlu1 %v3968_v57  ;;  %v691_v52 = vpop.xlane.xlu1 %690 }
 0x4c8   : > { %2952 = vpow2.f32 %v712_v17  ;;  %v701_v31 = vsub.f32 %v3869_v1, %v691_v52  ;;  %v1507_v5 = vpop.permute.xlu0 %1506 }
 0x4c9   : > { %1899 = vrot.lane.b32.xlu0 %v1876_v53, %s3149_s15  ;;  %v2048_v53 = vsel %vm511_vm1, %v1992_v36, 0.0 }
 0x4ca   : > { %v3975_v2 = vpop.eup %2948  ;;  %v714_v24 = vmul.f32 1.442695, %v701_v31  ;;  %v2051_v31 = vsel %vm511_vm1, %v3919_v18, 0.0 }
 0x4cb   : > { %724 = vadd.xlane.f32.xlu1 %v3975_v2  ;;  %v693_v12 = vpop.xlane.xlu1 %692 }
 0x4cc   : > { %2954 = vpow2.f32 %v714_v24  ;;  %v702_v50 = vsub.f32 %v3875_v60, %v693_v12  ;;  %v1998_v17 = vpop.permute.xlu0 %1997  ;;  %v1560_v24 = vsel %vm511_vm1, %v1503_v21, 0.0 }
 0x4cd   : > { %v2057_v18 = vsel %vm511_vm1, %v1998_v17, 0.0  ;;  %v2066_v17 = vsel %vm511_vm1, %v3933_v15, 0.0 }
 0x4ce   : > { %v3979_v6 = vpop.eup %2950  ;;  %v716_v56 = vmul.f32 1.442695, %v702_v50  ;;  %v1563_v50 = vsel %vm511_vm1, %v1505_v47, 0.0 }
 0x4cf   : > { %726 = vadd.xlane.f32.xlu1 %v3979_v6  ;;  %v695_v22 = vpop.xlane.xlu1 %694 }
 0x4d0   : > { %2956 = vpow2.f32 %v716_v56  ;;  %v703_v1 = vsub.f32 %v3883_v41, %v695_v22  ;;  %v1509_v41 = vpop.permute.xlu0 %1508  ;;  %v1566_v56 = vsel %vm511_vm1, %v1507_v5, 0.0 }
 0x4d1   : > { %v1569_v36 = vsel %vm511_vm1, %v1509_v41, 0.0 }
 0x4d2   : > { %v3983_v34 = vpop.eup %2952  ;;  %v718_v45 = vmul.f32 1.442695, %v703_v1  ;;  %v2054_v1 = vsel %vm511_vm1, %v1996_v37, 0.0  ;;  %v2063_v37 = vsel %vm511_vm1, %v3924_v44, 0.0 }
 0x4d3   : > { %728 = vadd.xlane.f32.xlu1 %v3983_v34 }
 0x4d4   : > { %2958 = vpow2.f32 %v718_v45  ;;  %v2000_v12 = vpop.permute.xlu0 %1999 }
 0x4d5   : > { %v2060_v47 = vsel %vm511_vm1, %v2000_v12, 0.0 }
 0x4d6   : > { %v3986_v19 = vpop.eup %2954 }
 0x4d7   : > { %730 = vadd.xlane.f32.xlu1 %v3986_v19 }
 0x4d8   : > { %v1511_v22 = vpop.permute.xlu0 %1510 }
 0x4d9   : > { %v1572_v21 = vsel %vm511_vm1, %v1511_v22, 0.0 }
 0x4da   : > { %v3989_v60 = vpop.eup %2956 }
 0x4db   : > { %732 = vadd.xlane.f32.xlu1 %v3989_v60 }
 0x4dc   : > { %v1513_v45 = vpop.permute.xlu0 %1512 }
 0x4dd   : > { %v1575_v5 = vsel %vm511_vm1, %v1513_v45, 0.0 }
 0x4de   : > { %v3992_v52 = vpop.eup %2958 }
 0x4df   : > { %734 = vadd.xlane.f32.xlu1 %v3992_v52 }
 0x4e3   : > { %2049 = vadd.xlane.f32.xlu1 %v2048_v53  ;;  %v1532_v53 = vpop.xlane.xlu0 %1531 }
 0x4e7   : > { %2052 = vadd.xlane.f32.xlu1 %v2051_v31  ;;  %v1535_v41 = vpop.xlane.xlu0 %1534 }
 0x4e8   : > { %1561 = vadd.xlane.f32.xlu0 %v1560_v24 }
 0x4eb   : > { %1564 = vadd.xlane.f32.xlu1 %v1563_v50  ;;  %v4011_v31 = vpop.xlane.xlu0 %2025 }
 0x4ec   : > { %1567 = vadd.xlane.f32.xlu0 %v1566_v56 }
 0x4ef   : > { %2055 = vadd.xlane.f32.xlu1 %v2054_v1  ;;  %v1538_v24 = vpop.xlane.xlu0 %1537  ;;  %v4019_v1 = vpop.xlane.xlu1 %2037 }
 0x4f0   : > { %1570 = vadd.xlane.f32.xlu0 %v1569_v36 }
 0x4f3   : > { %2058 = vadd.xlane.f32.xlu1 %v2057_v18  ;;  %v1541_v50 = vpop.xlane.xlu0 %1540  ;;  %v4023_v36 = vpop.xlane.xlu1 %2040 }
 0x4f4   : > { %1573 = vadd.xlane.f32.xlu0 %v1572_v21 }
 0x4f7   : > { %2061 = vadd.xlane.f32.xlu1 %v2060_v47  ;;  %v4013_v56 = vpop.permute.xlu0 %1394  ;;  %v1553_v18 = vpop.xlane.xlu1 %1552 }
 0x4f8   : > { %1576 = vadd.xlane.f32.xlu0 %v1575_v5 }
 0x4fb   : > { %2064 = vadd.xlane.f32.xlu1 %v2063_v37  ;;  %v4015_v12 = vpop.permute.xlu0 %1398  ;;  %v4031_v45 = vpop.xlane.xlu1 %2043 }
 0x4ff   : > { %2067 = vadd.xlane.f32.xlu1 %v2066_v17  ;;  %v4017_v22 = vpop.permute.xlu0 %1400  ;;  %v4038_v5 = vpop.permute.xlu1 %1404 }
 0x503   : > { %v4021_v44 = vpop.permute.xlu0 %1885 }
 0x507   : > { %v4025_v15 = vpop.permute.xlu0 %1887 }
 0x50b   : > { %v4027_v21 = vpop.xlane.xlu0 %2034 }
 0x50f   : > { %v4034_v47 = vpop.permute.xlu0 %1891 }
 0x514   : > { %v1556_v37 = vpop.xlane.xlu1 %1555 }
 0x525   : > { %1578 = vxpose.xlu0.b32.start [1/16] (narrow) %v1532_v53, 8  ;;  %v1550_v53 = vpop.xlane.xlu0 %1549 }
 0x529   : > { %1579 = vxpose.xlu0.b32.cont [2/16] (narrow) %v1535_v41, 8 }
 0x52d   : > { %1580 = vxpose.xlu0.b32.cont [3/16] (narrow) %v1538_v24, 8 }
 0x531   : > { %1581 = vxpose.xlu0.b32.cont [4/16] (narrow) %v1541_v50, 8 }
 0x532   : > { %1079 = vxpose.xlu1.b32.start [1/16] (narrow) %v3852_v0, 8  ;;  %v1559_v0 = vpop.xlane.xlu1 %1558 }
 0x535   : > { %1582 = vxpose.xlu0.b32.cont [5/16] (narrow) %v3953_v16, 8 }
 0x536   : > { %1080 = vxpose.xlu1.b32.cont [2/16] (narrow) %v3746_v10, 8  ;;  %v4044_v10 = vpop.permute.xlu1 %1897 }
 0x539   : > { %1583 = vxpose.xlu0.b32.cont [6/16] (narrow) %v3955_v38, 8 }
 0x53a   : > { %1081 = vxpose.xlu1.b32.cont [3/16] (narrow) %v3739_v9, 8  ;;  %v4047_v9 = vpop.permute.xlu0 %1402 }
 0x53d   : > { %1584 = vxpose.xlu0.b32.cont [7/16] (narrow) %v1550_v53, 8 }
 0x53e   : > { %1082 = vxpose.xlu1.b32.cont [4/16] (narrow) %v3864_v51, 8  ;;  %v4050_v38 = vpop.permute.xlu0 %1406 }
 0x541   : > { %1585 = vxpose.xlu0.b32.cont [8/16] (narrow) %v1553_v18, 8 }
 0x542   : > { %1083 = vxpose.xlu1.b32.cont [5/16] (narrow) %v3752_v29, 8 }
 0x545   : > { %1586 = vxpose.xlu0.b32.cont [9/16] (narrow) %v1556_v37, 8 }
 0x546   : > { %1084 = vxpose.xlu1.b32.cont [6/16] (narrow) %v3762_v35, 8  ;;  %v4054_v35 = vpop.permute.xlu0 %1408 }
 0x549   : > { %1587 = vxpose.xlu0.b32.cont [10/16] (narrow) %v1559_v0, 8 }
 0x54a   : > { %1085 = vxpose.xlu1.b32.cont [7/16] (narrow) %v3879_v46, 8  ;;  %v4059_v50 = vpop.permute.xlu0 %1893 }
 0x54e   : > { %1086 = vxpose.xlu1.b32.cont [8/16] (narrow) %v3759_v7, 8 }
 0x550   : > { %v721_v16 = vpop.xlane.xlu1 %720 }
 0x551   : > { %2960 = vrcp.f32 %v721_v16 }
 0x552   : > { %1087 = vxpose.xlu1.b32.cont [9/16] (narrow) %v3889_v58, 8 }
 0x554   : > { %v723_v51 = vpop.xlane.xlu1 %722 }
 0x555   : > { %2962 = vrcp.f32 %v723_v51 }
 0x556   : > { %1088 = vxpose.xlu1.b32.cont [10/16] (narrow) %v3766_v30, 8 }
 0x558   : > { %v725_v29 = vpop.xlane.xlu1 %724 }
 0x559   : > { %2964 = vrcp.f32 %v725_v29 }
 0x55a   : > { %1089 = vxpose.xlu1.b32.cont [11/16] (narrow) %v3886_v39, 8 }
 0x55b   : > { %v2961_v7 = vpop.eup %2960 }
 0x55c   : > { %v727_v46 = vpop.xlane.xlu1 %726  ;;  %v744_v17 = vmul.f32 %v2961_v7, %v3964_v20 }
 0x55d   : > { %2966 = vrcp.f32 %v727_v46 }
 0x55e   : > { %1090 = vxpose.xlu1.b32.cont [12/16] (narrow) %v3764_v26, 8  ;;  %v4063_v26 = vpop.permute.xlu0 %1895 }
 0x55f   : > { %v2963_v41 = vpop.eup %2962 }
 0x560   : > { %v729_v58 = vpop.xlane.xlu1 %728  ;;  %v745_v24 = vmul.f32 %v2963_v41, %v3968_v57 }
 0x561   : > { %2968 = vrcp.f32 %v729_v58 }
 0x562   : > { %1091 = vxpose.xlu1.b32.cont [13/16] (narrow) %v3899_v25, 8  ;;  %v752_v30 = vpack.c.bf16 %v745_v24, %v744_v17  ;;  %v2047_v25 = vpop.xlane.xlu0 %2046 }
 0x563   : > { %v2965_v18 = vpop.eup %2964 }
 0x564   : > { %2778 = vmatprep.mubr.bf16.mxu1 %v752_v30  ;;  %v731_v39 = vpop.xlane.xlu1 %730  ;;  %v746_v20 = vmul.f32 %v2965_v18, %v3975_v2  ;;  %v1915_v18 = vsel %vm511_vm1, %v3957_v32, 0.0 }
 0x565   : > { %2970 = vrcp.f32 %v731_v39 }
 0x566   : > { %1092 = vxpose.xlu1.b32.cont [14/16] (narrow) %v3774_v33, 8  ;;  %v4071_v2 = vpop.permute.xlu0 %1899 }
 0x567   : > { %v2967_v53 = vpop.eup %2966 }
 0x568   : > { %v733_v37 = vpop.xlane.xlu1 %732  ;;  %v747_v57 = vmul.f32 %v2967_v53, %v3979_v6 }
 0x569   : > { %2972 = vrcp.f32 %v733_v37 }
 0x56a   : > { %1093 = vxpose.xlu1.b32.cont [15/16] (narrow) %v3895_v43, 8  ;;  %v753_v0 = vpack.c.bf16 %v747_v57, %v746_v20  ;;  %v1430_v20 = vsel %vm511_vm1, %v4047_v9, 0.0 }
 0x56b   : > { %v2969_v51 = vpop.eup %2968 }
 0x56c   : > { %2779 = vmatmul.mubr.bf16.vlgmr.msra.gmra.mrb[0].mxu1 %v753_v0  ;;  %v735_v16 = vpop.xlane.xlu1 %734  ;;  %v748_v46 = vmul.f32 %v2969_v51, %v3983_v34  ;;  %v1927_v0 = vsel %vm511_vm1, %v4044_v10, 0.0  ;;  %v1427_v10 = vsel %vm511_vm1, %v4017_v22, 0.0  ;;  %v1918_v22 = vsel %vm511_vm1, %v4034_v47, 0.0 }
 0x56d   : > { %2974 = vrcp.f32 %v735_v16 }
 0x56e   : > { %1094 = vxpose.xlu1.b32.end [16/16] (narrow) %v3768_v28, 8 }
 0x56f   : > { %v2971_v33 = vpop.eup %2970 }
 0x570   : > { %v2050_v29 = vpop.xlane.xlu1 %2049  ;;  %v749_v7 = vmul.f32 %v2971_v33, %v3986_v19 }
 0x572   : > { %2069 = vxpose.xlu1.b32.start [1/16] (narrow) %v3938_v8, 8  ;;  %v754_v43 = vpack.c.bf16 %v749_v7, %v748_v46 }
 0x573   : > { %v2973_v41 = vpop.eup %2972 }
 0x574   : > { %2782 = vmatprep.mubr.bf16.mxu1 %v754_v43  ;;  %v2053_v6 = vpop.xlane.xlu1 %2052  ;;  %v750_v24 = vmul.f32 %v2973_v41, %v3989_v60  ;;  %v1433_v43 = vsel %vm511_vm1, %v4038_v5, 0.0  ;;  %v1924_v41 = vsel %vm511_vm1, %v4063_v26, 0.0 }
 0x575   : > { %v1562_v58 = vpop.xlane.xlu0 %1561 }
 0x576   : > { %2070 = vxpose.xlu1.b32.cont [2/16] (narrow) %v4011_v31, 8  ;;  %1588 = vxpose.xlu0.b32.cont [11/16] (narrow) %v1562_v58, 8 }
 0x577   : > { %v2975_v17 = vpop.eup %2974 }
 0x578   : > { %v1565_v28 = vpop.xlane.xlu1 %1564  ;;  %v751_v34 = vmul.f32 %v2975_v17, %v3992_v52  ;;  %v1930_v17 = vsel %vm511_vm1, %v4071_v2, 0.0 }
 0x579   : > { %v1568_v30 = vpop.xlane.xlu0 %1567 }
 0x57a   : > { %2071 = vxpose.xlu1.b32.cont [3/16] (narrow) %v3944_v49, 8  ;;  %1589 = vxpose.xlu0.b32.cont [12/16] (narrow) %v1565_v28, 8  ;;  %v755_v19 = vpack.c.bf16 %v751_v34, %v750_v24 }
 0x57c   : > { %2783 = vmatmul.mubr.bf16.gmra.mrb[4].mxu1 %v755_v19  ;;  %v2056_v49 = vpop.xlane.xlu1 %2055 }
 0x57d   : > { %v1571_v8 = vpop.xlane.xlu0 %1570 }
 0x57e   : > { %2072 = vxpose.xlu1.b32.cont [4/16] (narrow) %v3948_v14, 8  ;;  %1590 = vxpose.xlu0.b32.cont [13/16] (narrow) %v1568_v30, 8 }
 0x580   : > { %v2059_v52 = vpop.xlane.xlu1 %2058 }
 0x581   : > { %v1574_v31 = vpop.xlane.xlu0 %1573 }
 0x582   : > { %2073 = vxpose.xlu1.b32.cont [5/16] (narrow) %v4027_v21, 8  ;;  %1591 = vxpose.xlu0.b32.cont [14/16] (narrow) %v1571_v8, 8 }
 0x584   : > { %v2062_v14 = vpop.xlane.xlu1 %2061 }
 0x585   : > { %v1577_v60 = vpop.xlane.xlu0 %1576 }
 0x586   : > { %2074 = vxpose.xlu1.b32.cont [6/16] (narrow) %v4019_v1, 8  ;;  %1592 = vxpose.xlu0.b32.cont [15/16] (narrow) %v1574_v31, 8  ;;  %v1418_v1 = vsel %vm511_vm1, %v4013_v56, 0.0  ;;  %v1436_v56 = vsel %vm511_vm1, %v4050_v38, 0.0 }
 0x588   : > { %v2065_v21 = vpop.xlane.xlu1 %2064 }
 0x58a   : > { %2075 = vxpose.xlu1.b32.cont [7/16] (narrow) %v4023_v36, 8  ;;  %1593 = vxpose.xlu0.b32.end [16/16] (narrow) %v1577_v60, 8  ;;  %v1424_v36 = vsel %vm511_vm1, %v4015_v12, 0.0  ;;  %v4660_v60 = vld [vmem:[#allocation13_spill] sm:$0xff] }
 0x58c   : > { %v2068_v39 = vpop.xlane.xlu1 %2067 }
 0x58e   : > { %2076 = vxpose.xlu1.b32.cont [8/16] (narrow) %v4031_v45, 8  ;;  %v1909_v45 = vsel %vm511_vm1, %v4021_v44, 0.0  ;;  %v1921_v44 = vsel %vm511_vm1, %v4059_v50, 0.0 }
 0x592   : > { %2077 = vxpose.xlu1.b32.cont [9/16] (narrow) %v2047_v25, 8 }
 0x596   : > { %2078 = vxpose.xlu1.b32.cont [10/16] (narrow) %v2050_v29, 8  ;;  %v1912_v29 = vsel %vm511_vm1, %v4025_v15, 0.0  ;;  %v1439_v15 = vsel %vm511_vm1, %v4054_v35, 0.0 }
 0x59a   : > { %2079 = vxpose.xlu1.b32.cont [11/16] (narrow) %v2053_v6, 8 }
 0x59e   : > { %2080 = vxpose.xlu1.b32.cont [12/16] (narrow) %v2056_v49, 8 }
 0x5a2   : > { %2081 = vxpose.xlu1.b32.cont [13/16] (narrow) %v2059_v52, 8 }
 0x5a6   : > { %2082 = vxpose.xlu1.b32.cont [14/16] (narrow) %v2062_v14, 8 }
 0x5aa   : > { %2083 = vxpose.xlu1.b32.cont [15/16] (narrow) %v2065_v21, 8 }
 0x5ae   : > { %2084 = vxpose.xlu1.b32.end [16/16] (narrow) %v2068_v39, 8 }
 0x5b2   : > { %v1095_v53 = vpop.trf.xlu1 }
 0x5b3   : > { %v1114_v37 = vrot.slane %v1095_v53, %v3798_v42 }
 0x5b5   : > { %v1115_v12 = vadd.f32 %v1114_v37, %v3901_v23  ;;  %v1117_v32 = vadd.f32 %v1114_v37, %v3770_v63  ;;  %v1119_v16 = vadd.f32 %v1114_v37, %v3910_v13  ;;  %v1421_v23 = vsel %vm511_vm1, %v3951_v27, 0.0 }
 0x5b6   : > { %v1121_v51 = vadd.f32 %v1114_v37, %v3915_v4  ;;  %v1116_v6 = vadd.f32 %v1114_v37, %v3903_v40  ;;  %v1118_v58 = vadd.f32 %v1114_v37, %v3907_v62  ;;  %v1120_v24 = vadd.f32 %v1114_v37, %v3913_v54  ;;  %v4658_v62 = vld [vmem:[#allocation11_spill] sm:$0xff]  ;;  %v4659_v54 = vld [vmem:[#allocation12_spill] sm:$0xff] }
 0x5b7   : > { %1419 = vadd.xlane.f32.xlu0 %v1418_v1  ;;  %v1131_v57 = vmul.f32 0.2, %v1115_v12  ;;  %vm1123_vm10 = vcmp.gt.f32.partialorder %v1115_v12, 0.0  ;;  %v1133_v9 = vmul.f32 0.2, %v1117_v32  ;;  %vm1125_vm11 = vcmp.gt.f32.partialorder %v1117_v32, 0.0 }
 0x5b8   : > { %v1135_v63 = vmul.f32 0.2, %v1119_v16  ;;  %vm1127_vm12 = vcmp.gt.f32.partialorder %v1119_v16, 0.0  ;;  %v1137_v27 = vmul.f32 0.2, %v1121_v51  ;;  %vm1129_vm13 = vcmp.gt.f32.partialorder %v1121_v51, 0.0 }
 0x5b9   : > { %v1139_v25 = vsel %vm1123_vm10, %v1115_v12, %v1131_v57  ;;  %v1141_v50 = vsel %vm1125_vm11, %v1117_v32, %v1133_v9  ;;  %v1132_v47 = vmul.f32 0.2, %v1116_v6  ;;  %vm1124_vm14 = vcmp.gt.f32.partialorder %v1116_v6, 0.0 }
 0x5ba   : > { %v4106_v38 = vadd.f32 %v3821_v55, %v1139_v25  ;;  %v4113_v13 = vadd.f32 %v3835_v61, %v1141_v50  ;;  %v1143_v33 = vsel %vm1127_vm12, %v1119_v16, %v1135_v63  ;;  %v1145_v46 = vsel %vm1129_vm13, %v1121_v51, %v1137_v27 }
 0x5bb   : > { %1425 = vadd.xlane.f32.xlu0 %v1424_v36  ;;  %v4119_v4 = vadd.f32 %v3850_v3, %v1143_v33  ;;  %v4125_v7 = vadd.f32 %v3871_v59, %v1145_v46  ;;  %v1140_v28 = vsel %vm1124_vm14, %v1116_v6, %v1132_v47  ;;  %v1134_v5 = vmul.f32 0.2, %v1118_v58 }
 0x5bc   : > { %vm1126_vm15 = vcmp.gt.f32.partialorder %v1118_v58, 0.0  ;;  %v4140_v40 = vadd.f32 %v3827_v11, %v1140_v28  ;;  %v1136_v34 = vmul.f32 0.2, %v1120_v24  ;;  %v1122_v26 = vadd.f32 %v1114_v37, %v3917_v48 }
 0x5bd   : > { %v1142_v35 = vsel %vm1126_vm15, %v1118_v58, %v1134_v5  ;;  %vm1128_vm0 = vcmp.gt.f32.partialorder %v1120_v24, 0.0 }
 0x5be   : > { %v4145_v30 = vadd.f32 %v4658_v62, %v1142_v35  ;;  %v1144_v2 = vsel %vm1128_vm0, %v1120_v24, %v1136_v34  ;;  %v1138_v19 = vmul.f32 0.2, %v1122_v26  ;;  %vm1130_vm2 = vcmp.gt.f32.partialorder %v1122_v26, 0.0 }
 0x5bf   : > { %1910 = vadd.xlane.f32.xlu0 %v1909_v45  ;;  %v4149_v8 = vadd.f32 %v4659_v54, %v1144_v2 }
 0x5c0   : > { %v1146_v31 = vsel %vm1130_vm2, %v1122_v26, %v1138_v19 }
 0x5c1   : > { %v4153_v49 = vadd.f32 %v4660_v60, %v1146_v31 }
 0x5c3   : > { %1916 = vadd.xlane.f32.xlu0 %v1915_v18 }
 0x5c7   : > { %1431 = vadd.xlane.f32.xlu0 %v1430_v20 }
 0x5cb   : > { %1437 = vadd.xlane.f32.xlu0 %v1436_v56 }
 0x5ce   : > { %v1594_v48 = vpop.trf.xlu0 }
 0x5cf   : > { %1922 = vadd.xlane.f32.xlu0 %v1921_v44  ;;  %v4161_v21 = vrot.slane %v1594_v48, %v3798_v42 }
 0x5d3   : > { %1928 = vadd.xlane.f32.xlu0 %v1927_v0 }
 0x5d5   : > { %1422 = vadd.xlane.f32.xlu1 %v1421_v23 }
 0x5d7   : > { %1155 = vmax.xlane.f32.xlu0 %v4106_v38 }
 0x5d9   : > { %1428 = vadd.xlane.f32.xlu1 %v1427_v10 }
 0x5db   : > { %1159 = vmax.xlane.f32.xlu0 %v4113_v13 }
 0x5dd   : > { %1913 = vadd.xlane.f32.xlu1 %v1912_v29 }
 0x5df   : > { %1163 = vmax.xlane.f32.xlu0 %v4119_v4 }
 0x5e1   : > { %1919 = vadd.xlane.f32.xlu1 %v1918_v22 }
 0x5e3   : > { %1167 = vmax.xlane.f32.xlu0 %v4125_v7 }
 0x5e5   : > { %1434 = vadd.xlane.f32.xlu1 %v1433_v43 }
 0x5e9   : > { %1440 = vadd.xlane.f32.xlu1 %v1439_v15 }
 0x5ed   : > { %1925 = vadd.xlane.f32.xlu1 %v1924_v41 }
 0x5f1   : > { %1931 = vadd.xlane.f32.xlu1 %v1930_v17 }
 0x5f2   : > { %v2085_v18 = vpop.trf.xlu1 }
 0x5f3   : > { %v4170_v56 = vrot.slane %v2085_v18, %v3798_v42 }
 0x5f5   : > { %1157 = vmax.xlane.f32.xlu1 %v4140_v40 }
 0x5f9   : > { %1161 = vmax.xlane.f32.xlu1 %v4145_v30 }
 0x5fd   : > { %1165 = vmax.xlane.f32.xlu1 %v4149_v8 }
 0x601   : > { %1169 = vmax.xlane.f32.xlu1 %v4153_v49 }
 0x63f   : > { %v4156_v52 = vpop.f32.mrb[0].mxu1 }
 0x640   : > { %v4158_v14 = vpop.f32.mrb[1].mxu1 }
 0x641   : > { %v4163_v39 = vpop.f32.mrb[2].mxu1 }
 0x642   : > { %v4165_v1 = vpop.f32.mrb[3].mxu1 }
 0x644   : > { %v1420_v36 = vpop.xlane.xlu0 %1419 }
 0x645   : > { %v1614_v45 = vadd.f32 %v4161_v21, %v1420_v36 }
 0x647   : > { %vm1622_vm3 = vcmp.gt.f32.partialorder %v1614_v45, 0.0  ;;  %v1630_v53 = vmul.f32 0.2, %v1614_v45 }
 0x648   : > { %v1426_v37 = vpop.xlane.xlu0 %1425 }
 0x649   : > { %v1616_v20 = vadd.f32 %v4161_v21, %v1426_v37  ;;  %v1638_v12 = vsel %vm1622_vm3, %v1614_v45, %v1630_v53 }
 0x64a   : > { %v4173_v44 = vadd.f32 %v3821_v55, %v1638_v12 }
 0x64b   : > { %vm1624_vm4 = vcmp.gt.f32.partialorder %v1616_v20, 0.0  ;;  %v1632_v57 = vmul.f32 0.2, %v1616_v20 }
 0x64c   : > { %v1911_v32 = vpop.xlane.xlu0 %1910  ;;  %1654 = vmax.xlane.f32.xlu0 %v4173_v44 }
 0x64d   : > { %v2105_v0 = vadd.f32 %v4170_v56, %v1911_v32  ;;  %v1640_v25 = vsel %vm1624_vm4, %v1616_v20, %v1632_v57 }
 0x64e   : > { %v4178_v9 = vadd.f32 %v3835_v61, %v1640_v25 }
 0x64f   : > { %v4180_v16 = vpop.f32.mrb[4].mxu1  ;;  %v2121_v23 = vmul.f32 0.2, %v2105_v0  ;;  %vm2113_vm5 = vcmp.gt.f32.partialorder %v2105_v0, 0.0 }
 0x650   : > { %v4182_v42 = vpop.f32.mrb[5].mxu1  ;;  %v1917_v50 = vpop.xlane.xlu0 %1916  ;;  %1658 = vmax.xlane.f32.xlu0 %v4178_v9 }
 0x651   : > { %v2107_v63 = vadd.f32 %v4170_v56, %v1917_v50  ;;  %v4186_v51 = vpop.f32.mrb[6].mxu1  ;;  %v2129_v29 = vsel %vm2113_vm5, %v2105_v0, %v2121_v23 }
 0x652   : > { %v4188_v10 = vpop.f32.mrb[7].mxu1  ;;  %v4192_v22 = vadd.f32 %v3821_v55, %v2129_v29 }
 0x653   : > { %vm2115_vm6 = vcmp.gt.f32.partialorder %v2107_v63, 0.0  ;;  %v2123_v33 = vmul.f32 0.2, %v2107_v63 }
 0x654   : > { %v1432_v27 = vpop.xlane.xlu0 %1431  ;;  %2145 = vmax.xlane.f32.xlu0 %v4192_v22 }
 0x655   : > { %v1618_v46 = vadd.f32 %v4161_v21, %v1432_v27  ;;  %v2131_v43 = vsel %vm2115_vm6, %v2107_v63, %v2123_v33 }
 0x656   : > { %v4196_v6 = vadd.f32 %v3835_v61, %v2131_v43 }
 0x657   : > { %vm1626_vm7 = vcmp.gt.f32.partialorder %v1618_v46, 0.0  ;;  %v1634_v15 = vmul.f32 0.2, %v1618_v46 }
 0x658   : > { %v1438_v41 = vpop.xlane.xlu0 %1437  ;;  %2149 = vmax.xlane.f32.xlu0 %v4196_v6 }
 0x659   : > { %v1620_v47 = vadd.f32 %v4161_v21, %v1438_v41  ;;  %v1642_v58 = vsel %vm1626_vm7, %v1618_v46, %v1634_v15 }
 0x65a   : > { %v4201_v28 = vadd.f32 %v3850_v3, %v1642_v58 }
 0x65b   : > { %vm1628_vm8 = vcmp.gt.f32.partialorder %v1620_v47, 0.0  ;;  %v1636_v17 = vmul.f32 0.2, %v1620_v47 }
 0x65c   : > { %v1923_v55 = vpop.xlane.xlu0 %1922  ;;  %1662 = vmax.xlane.f32.xlu0 %v4201_v28 }
 0x65d   : > { %v2109_v5 = vadd.f32 %v4170_v56, %v1923_v55  ;;  %v1644_v24 = vsel %vm1628_vm8, %v1620_v47, %v1636_v17 }
 0x65e   : > { %v4206_v61 = vadd.f32 %v3871_v59, %v1644_v24 }
 0x65f   : > { %vm2117_vm9 = vcmp.gt.f32.partialorder %v2109_v5, 0.0  ;;  %v2125_v35 = vmul.f32 0.2, %v2109_v5 }
 0x660   : > { %v1929_v34 = vpop.xlane.xlu0 %1928  ;;  %1666 = vmax.xlane.f32.xlu0 %v4206_v61 }
 0x661   : > { %v2111_v26 = vadd.f32 %v4170_v56, %v1929_v34  ;;  %v2133_v2 = vsel %vm2117_vm9, %v2109_v5, %v2125_v35 }
 0x662   : > { %v1423_v19 = vpop.xlane.xlu1 %1422  ;;  %v4212_v36 = vadd.f32 %v3850_v3, %v2133_v2 }
 0x663   : > { %vm2119_vm10 = vcmp.gt.f32.partialorder %v2111_v26, 0.0  ;;  %v2127_v31 = vmul.f32 0.2, %v2111_v26  ;;  %v1615_v48 = vadd.f32 %v4161_v21, %v1423_v19 }
 0x664   : > { %2153 = vmax.xlane.f32.xlu0 %v4212_v36  ;;  %v1156_v41 = vpop.xlane.xlu0 %1155 }
 0x665   : > { %vm1623_vm11 = vcmp.gt.f32.partialorder %v1615_v48, 0.0  ;;  %v1631_v45 = vmul.f32 0.2, %v1615_v48  ;;  %v2135_v18 = vsel %vm2119_vm10, %v2111_v26, %v2127_v31 }
 0x666   : > { %v1429_v53 = vpop.xlane.xlu1 %1428  ;;  %v4217_v20 = vadd.f32 %v3871_v59, %v2135_v18 }
 0x667   : > { %v1617_v37 = vadd.f32 %v4161_v21, %v1429_v53  ;;  %v1639_v12 = vsel %vm1623_vm11, %v1615_v48, %v1631_v45  ;;  %v4661_v53 = vld [vmem:[#allocation3_spill] sm:$0xff] }
 0x668   : > { %v4220_v57 = vadd.f32 %v3827_v11, %v1639_v12  ;;  %2157 = vmax.xlane.f32.xlu0 %v4217_v20  ;;  %v1160_v45 = vpop.xlane.xlu0 %1159 }
 0x669   : > { %vm1625_vm12 = vcmp.gt.f32.partialorder %v1617_v37, 0.0  ;;  %v1633_v32 = vmul.f32 0.2, %v1617_v37 }
 0x66a   : > { %1656 = vmax.xlane.f32.xlu1 %v4220_v57  ;;  %v1914_v3 = vpop.xlane.xlu1 %1913 }
 0x66b   : > { %v2106_v0 = vadd.f32 %v4170_v56, %v1914_v3  ;;  %v1641_v25 = vsel %vm1625_vm12, %v1617_v37, %v1633_v32  ;;  %v1173_v32 = vsub.f32 %v4113_v13, %v1160_v45  ;;  %v4663_v13 = vld [vmem:[#allocation6_spill] sm:$0xff] }
 0x66c   : > { %v4226_v23 = vadd.f32 %v4658_v62, %v1641_v25  ;;  %v4662_v25 = vld [vmem:[#allocation5_spill] sm:$0xff] }
 0x66d   : > { %vm2114_vm13 = vcmp.gt.f32.partialorder %v2106_v0, 0.0  ;;  %v2122_v59 = vmul.f32 0.2, %v2106_v0 }
 0x66e   : > { %1660 = vmax.xlane.f32.xlu1 %v4226_v23  ;;  %v1920_v50 = vpop.xlane.xlu1 %1919 }
 0x66f   : > { %v2108_v63 = vadd.f32 %v4170_v56, %v1920_v50  ;;  %v2130_v33 = vsel %vm2114_vm13, %v2106_v0, %v2122_v59  ;;  %v1183_v50 = vmul.f32 1.442695, %v1173_v32 }
 0x670   : > { %v4231_v27 = vadd.f32 %v3827_v11, %v2130_v33  ;;  %v1171_v11 = vsub.f32 %v4106_v38, %v1156_v41 }
 0x671   : > { %vm2116_vm14 = vcmp.gt.f32.partialorder %v2108_v63, 0.0  ;;  %v2124_v29 = vmul.f32 0.2, %v2108_v63 }
 0x672   : > { %2147 = vmax.xlane.f32.xlu1 %v4231_v27  ;;  %v1435_v46 = vpop.xlane.xlu1 %1434 }
 0x673   : > { %v1619_v43 = vadd.f32 %v4161_v21, %v1435_v46  ;;  %v2132_v15 = vsel %vm2116_vm14, %v2108_v63, %v2124_v29  ;;  %v4665_v46 = vld [vmem:[#allocation9_spill] sm:$0xff] }
 0x674   : > { %v4236_v47 = vadd.f32 %v4658_v62, %v2132_v15  ;;  %v1179_v62 = vmul.f32 1.442695, %v1171_v11 }
 0x675   : > { %vm1627_vm15 = vcmp.gt.f32.partialorder %v1619_v43, 0.0  ;;  %v1635_v58 = vmul.f32 0.2, %v1619_v43 }
 0x676   : > { %2151 = vmax.xlane.f32.xlu1 %v4236_v47  ;;  %v1441_v17 = vpop.xlane.xlu1 %1440  ;;  %2976 = vpow2.f32 %v1179_v62 }
 0x677   : > { %v1621_v55 = vadd.f32 %v4161_v21, %v1441_v17  ;;  %v1643_v5 = vsel %vm1627_vm15, %v1619_v43, %v1635_v58  ;;  %v1164_v43 = vpop.xlane.xlu0 %1163 }
 0x678   : > { %v4242_v24 = vadd.f32 %v4659_v54, %v1643_v5 }
 0x679   : > { %vm1629_vm0 = vcmp.gt.f32.partialorder %v1621_v55, 0.0  ;;  %v1637_v35 = vmul.f32 0.2, %v1621_v55 }
 0x67a   : > { %1664 = vmax.xlane.f32.xlu1 %v4242_v24  ;;  %v1926_v34 = vpop.xlane.xlu1 %1925 }
 0x67b   : > { %v2110_v26 = vadd.f32 %v4170_v56, %v1926_v34  ;;  %v1645_v2 = vsel %vm1629_vm0, %v1621_v55, %v1637_v35  ;;  %v1168_v17 = vpop.xlane.xlu0 %1167 }
 0x67c   : > { %v4247_v19 = vadd.f32 %v4660_v60, %v1645_v2  ;;  %v1177_v11 = vsub.f32 %v4125_v7, %v1168_v17 }
 0x67d   : > { %vm2118_vm2 = vcmp.gt.f32.partialorder %v2110_v26, 0.0  ;;  %v2126_v38 = vmul.f32 0.2, %v2110_v26 }
 0x67e   : > { %1668 = vmax.xlane.f32.xlu1 %v4247_v19  ;;  %v1932_v21 = vpop.xlane.xlu1 %1931  ;;  %1239 = vrot.lane.b32.xlu0 %v4661_v53, %s3148_s14  ;;  %v1191_v35 = vmul.f32 1.442695, %v1177_v11 }
 0x67f   : > { %v2112_v31 = vadd.f32 %v4170_v56, %v1932_v21  ;;  %v2134_v48 = vsel %vm2118_vm2, %v2110_v26, %v2126_v38  ;;  %v4666_v26 = vld [vmem:[#allocation4_spill] sm:$0xff] }
 0x680   : > { %v4252_v18 = vadd.f32 %v4659_v54, %v2134_v48  ;;  %v4266_v33 = vpop.eup %2976  ;;  %v4667_v38 = vld [vmem:[#allocation8_spill] sm:$0xff] }
 0x681   : > { %vm2120_vm3 = vcmp.gt.f32.partialorder %v2112_v31, 0.0  ;;  %v2128_v37 = vmul.f32 0.2, %v2112_v31 }
 0x682   : > { %2155 = vmax.xlane.f32.xlu1 %v4252_v18  ;;  %v1158_v12 = vpop.xlane.xlu1 %1157  ;;  %1243 = vrot.lane.b32.xlu0 %v4662_v25, %s3148_s14 }
 0x683   : > { %v1172_v3 = vsub.f32 %v4140_v40, %v1158_v12  ;;  %v2136_v0 = vsel %vm2120_vm3, %v2112_v31, %v2128_v37  ;;  %v4668_v12 = vld [vmem:[#allocation10_spill] sm:$0xff] }
 0x684   : > { %v4260_v56 = vadd.f32 %v4660_v60, %v2136_v0  ;;  %v4664_v60 = vld [vmem:[#allocation7_spill] sm:$0xff] }
 0x685   : > { %v1181_v54 = vmul.f32 1.442695, %v1172_v3 }
 0x686   : > { %2159 = vmax.xlane.f32.xlu1 %v4260_v56  ;;  %v1162_v59 = vpop.xlane.xlu1 %1161  ;;  %1245 = vrot.lane.b32.xlu0 %v4663_v13, %s3148_s14 }
 0x687   : > { %2978 = vpow2.f32 %v1181_v54  ;;  %v1174_v63 = vsub.f32 %v4145_v30, %v1162_v59 }
 0x688   : > { %2980 = vpow2.f32 %v1183_v50 }
 0x689   : > { %v1185_v40 = vmul.f32 1.442695, %v1174_v63 }
 0x68a   : > { %1195 = vadd.xlane.f32.xlu1 %v4266_v33  ;;  %1247 = vrot.lane.b32.xlu0 %v4664_v60, %s3148_s14  ;;  %v1166_v41 = vpop.xlane.xlu1 %1165 }
 0x68b   : > { %2982 = vpow2.f32 %v1185_v40  ;;  %v1176_v58 = vsub.f32 %v4149_v8, %v1166_v41 }
 0x68d   : > { %v1189_v55 = vmul.f32 1.442695, %v1176_v58 }
 0x68e   : > { %1251 = vrot.lane.b32.xlu0 %v4665_v46, %s3148_s14  ;;  %v1170_v5 = vpop.xlane.xlu1 %1169 }
 0x68f   : > { %2984 = vpow2.f32 %v1189_v55  ;;  %v1178_v34 = vsub.f32 %v4153_v49, %v1170_v5  ;;  %v1175_v49 = vsub.f32 %v4119_v4, %v1164_v43 }
 0x690   : > { %2986 = vpow2.f32 %v1191_v35 }
 0x691   : > { %v4273_v29 = vpop.eup %2978  ;;  %v1193_v62 = vmul.f32 1.442695, %v1178_v34  ;;  %v1187_v21 = vmul.f32 1.442695, %v1175_v49 }
 0x692   : > { %1197 = vadd.xlane.f32.xlu1 %v4273_v29  ;;  %v4278_v30 = vpop.eup %2980 }
 0x693   : > { %2988 = vpow2.f32 %v1193_v62 }
 0x694   : > { %2990 = vpow2.f32 %v1187_v21 }
 0x695   : > { %v4281_v15 = vpop.eup %2982 }
 0x696   : > { %1199 = vadd.xlane.f32.xlu1 %v4278_v30 }
 0x699   : > { %v4289_v2 = vpop.eup %2984 }
 0x69a   : > { %1201 = vadd.xlane.f32.xlu1 %v4281_v15  ;;  %v4294_v7 = vpop.eup %2986 }
 0x69d   : > { %v4297_v8 = vpop.eup %2988 }
 0x69e   : > { %v4303_v31 = vpop.eup %2990 }
 0x6ab   : > { %1241 = vrot.lane.b32.xlu1 %v4666_v26, %s3148_s14 }
 0x6ad   : > { %1205 = vadd.xlane.f32.xlu0 %v4289_v2 }
 0x6af   : > { %1249 = vrot.lane.b32.xlu1 %v4667_v38, %s3148_s14 }
 0x6b1   : > { %1207 = vadd.xlane.f32.xlu0 %v4294_v7 }
 0x6b5   : > { %1209 = vadd.xlane.f32.xlu0 %v4297_v8 }
 0x6cb   : > { %1730 = vrot.lane.b32.xlu0 %v4661_v53, %s3147_s13 }
 0x6d3   : > { %1203 = vadd.xlane.f32.xlu1 %v4303_v31 }
 0x6d9   : > { %v1655_v48 = vpop.xlane.xlu0 %1654 }
 0x6da   : > { %v1670_v40 = vsub.f32 %v4173_v44, %v1655_v48 }
 0x6dc   : > { %v1678_v11 = vmul.f32 1.442695, %v1670_v40 }
 0x6dd   : > { %v1659_v45 = vpop.xlane.xlu0 %1658 }
 0x6de   : > { %v1672_v59 = vsub.f32 %v4178_v9, %v1659_v45 }
 0x6e0   : > { %v1682_v58 = vmul.f32 1.442695, %v1672_v59 }
 0x6e1   : > { %v2146_v37 = vpop.xlane.xlu0 %2145 }
 0x6e4   : > { %1253 = vrot.lane.b32.xlu1 %v4668_v12, %s3148_s14 }
 0x6e5   : > { %v2150_v32 = vpop.xlane.xlu0 %2149 }
 0x6e6   : > { %v2163_v34 = vsub.f32 %v4196_v6, %v2150_v32 }
 0x6e8   : > { %2221 = vrot.lane.b32.xlu1 %v4661_v53, %s3149_s15  ;;  %v2161_v53 = vsub.f32 %v4192_v22, %v2146_v37 }
 0x6e9   : > { %v4310_v4 = vpop.xlane.xlu0 %1662 }
 0x6ea   : > { %v2169_v9 = vmul.f32 1.442695, %v2161_v53 }
 0x6ed   : > { %v4312_v3 = vpop.xlane.xlu0 %1666 }
 0x6f1   : > { %v4314_v0 = vpop.xlane.xlu0 %2153 }
 0x6f5   : > { %v4317_v50 = vpop.xlane.xlu0 %2157 }
 0x6f7   : > { %v1657_v54 = vpop.xlane.xlu1 %1656 }
 0x6f8   : > { %v1671_v63 = vsub.f32 %v4220_v57, %v1657_v54 }
 0x6f9   : > { %v1240_v17 = vpop.permute.xlu0 %1239 }
 0x6fa   : > { %v1680_v43 = vmul.f32 1.442695, %v1671_v63  ;;  %2786 = vmatprep.subr.bf16.mxu0 %v1240_v17 }
 0x6fb   : > { %v1661_v41 = vpop.xlane.xlu1 %1660  ;;  %2787 = vmatpush3.bf16.msra.mxu0 %v1240_v17 }
 0x6fc   : > { %2992 = vpow2.f32 %v1680_v43  ;;  %v1673_v55 = vsub.f32 %v4226_v23, %v1661_v41  ;;  %v2173_v23 = vmul.f32 1.442695, %v2163_v34 }
 0x6fd   : > { %2994 = vpow2.f32 %v1682_v58  ;;  %v1244_v53 = vpop.permute.xlu0 %1243 }
 0x6fe   : > { %2996 = vpow2.f32 %v1678_v11  ;;  %v1684_v35 = vmul.f32 1.442695, %v1673_v55 }
 0x6ff   : > { %v2148_v5 = vpop.xlane.xlu1 %2147  ;;  %2998 = vpow2.f32 %v2169_v9 }
 0x700   : > { %v2162_v57 = vsub.f32 %v4231_v27, %v2148_v5  ;;  %3000 = vpow2.f32 %v1684_v35 }
 0x702   : > { %v2171_v22 = vmul.f32 1.442695, %v2162_v57  ;;  %v1246_v57 = vpop.permute.xlu0 %1245 }
 0x703   : > { %v2152_v44 = vpop.xlane.xlu1 %2151 }
 0x704   : > { %3002 = vpow2.f32 %v2171_v22  ;;  %v2164_v21 = vsub.f32 %v4236_v47, %v2152_v44  ;;  %v1676_v22 = vsub.f32 %v4206_v61, %v4312_v3 }
 0x705   : > { %3004 = vpow2.f32 %v2173_v23 }
 0x706   : > { %v4325_v62 = vpop.eup %2992  ;;  %v2175_v6 = vmul.f32 1.442695, %v2164_v21  ;;  %v1248_v34 = vpop.permute.xlu0 %1247  ;;  %v1690_v21 = vmul.f32 1.442695, %v1676_v22 }
 0x707   : > { %1696 = vadd.xlane.f32.xlu0 %v4325_v62  ;;  %v4328_v49 = vpop.xlane.xlu1 %1664  ;;  %v4331_v48 = vpop.eup %2994 }
 0x708   : > { %v4333_v45 = vpop.eup %2996  ;;  %3006 = vpow2.f32 %v2175_v6  ;;  %v1675_v61 = vsub.f32 %v4242_v24, %v4328_v49 }
 0x709   : > { %v4337_v37 = vpop.eup %2998 }
 0x70a   : > { %v4339_v32 = vpop.eup %3000 }
 0x70b   : > { %1698 = vadd.xlane.f32.xlu0 %v4331_v48  ;;  %v1669_v27 = vpop.xlane.xlu1 %1668 }
 0x70c   : > { %1694 = vadd.xlane.f32.xlu1 %v4333_v45 }
 0x70e   : > { %v4345_v47 = vpop.eup %3002 }
 0x70f   : > { %2185 = vadd.xlane.f32.xlu0 %v4337_v37  ;;  %v4342_v54 = vpop.xlane.xlu1 %2155  ;;  %v4350_v63 = vpop.eup %3004 }
 0x710   : > { %1700 = vadd.xlane.f32.xlu1 %v4339_v32 }
 0x712   : > { %v4353_v40 = vpop.eup %3006 }
 0x713   : > { %v4348_v59 = vpop.xlane.xlu1 %2159 }
 0x714   : > { %2187 = vadd.xlane.f32.xlu1 %v4345_v47 }
 0x717   : > { %v1196_v43 = vpop.xlane.xlu1 %1195 }
 0x718   : > { %2189 = vadd.xlane.f32.xlu1 %v4350_v63  ;;  %3008 = vrcp.f32 %v1196_v43 }
 0x71c   : > { %2191 = vadd.xlane.f32.xlu1 %v4353_v40 }
 0x71f   : > { %v1198_v41 = vpop.xlane.xlu1 %1197 }
 0x720   : > { %3010 = vrcp.f32 %v1198_v41 }
 0x722   : > { %v3009_v11 = vpop.eup %3008 }
 0x723   : > { %v4356_v58 = vpop.xlane.xlu1 %1199  ;;  %v1219_v9 = vmul.f32 %v3009_v11, %v4266_v33  ;;  %v1674_v33 = vsub.f32 %v4201_v28, %v4310_v4  ;;  %v2165_v28 = vsub.f32 %v4212_v36, %v4314_v0  ;;  %v2167_v36 = vsub.f32 %v4217_v20, %v4317_v50 }
 0x725   : > { %1732 = vrot.lane.b32.xlu0 %v4666_v26, %s3147_s13  ;;  %v2177_v3 = vmul.f32 1.442695, %v2165_v28  ;;  %v2181_v49 = vmul.f32 1.442695, %v2167_v36 }
 0x727   : > { %v4360_v17 = vpop.xlane.xlu1 %1201 }
 0x729   : > { %1734 = vrot.lane.b32.xlu0 %v4662_v25, %s3147_s13 }
 0x72a   : > { %v3011_v55 = vpop.eup %3010 }
 0x72b   : > { %v1242_v5 = vpop.permute.xlu1 %1241  ;;  %v1220_v35 = vmul.f32 %v3011_v55, %v4273_v29  ;;  %v1686_v29 = vmul.f32 1.442695, %v1674_v33 }
 0x72c   : > { %2788 = vmatprep.subr.bf16.mxu0 %v1242_v5 }
 0x72d   : > { %2223 = vrot.lane.b32.xlu1 %v4666_v26, %s3149_s15  ;;  %2789 = vmatpush3.bf16.msra.mxu0 %v1242_v5  ;;  %v1227_v44 = vpack.c.bf16 %v1220_v35, %v1219_v9  ;;  %v1252_v26 = vpop.permute.xlu0 %1251  ;;  %3012 = vpow2.f32 %v1686_v29 }
 0x72e   : > { %2790 = vmatprep.subr.bf16.mxu0 %v1244_v53  ;;  %3014 = vpow2.f32 %v1690_v21 }
 0x72f   : > { %2802 = vmatprep.mubr.bf16.mxu0 %v1227_v44  ;;  %v1250_v23 = vpop.permute.xlu1 %1249 }
 0x731   : > { %2225 = vrot.lane.b32.xlu1 %v4662_v25, %s3149_s15  ;;  %2791 = vmatpush3.bf16.msra.mxu0 %v1244_v53  ;;  %v1677_v25 = vsub.f32 %v4247_v19, %v1669_v27  ;;  %v1688_v53 = vmul.f32 1.442695, %v1675_v61  ;;  %v2166_v19 = vsub.f32 %v4252_v18, %v4342_v54  ;;  %v2168_v18 = vsub.f32 %v4260_v56, %v4348_v59 }
 0x732   : > { %2792 = vmatprep.subr.bf16.mxu0 %v1246_v57 }
 0x733   : > { %v1692_v4 = vmul.f32 1.442695, %v1677_v25  ;;  %v2179_v0 = vmul.f32 1.442695, %v2166_v19  ;;  %v2183_v55 = vmul.f32 1.442695, %v2168_v18 }
 0x735   : > { %2793 = vmatpush3.bf16.msra.mxu0 %v1246_v57  ;;  %3016 = vpow2.f32 %v1692_v4 }
 0x736   : > { %2794 = vmatprep.subr.bf16.mxu0 %v1248_v34  ;;  %3018 = vpow2.f32 %v2177_v3 }
 0x737   : > { %v4381_v27 = vpop.eup %3012  ;;  %3020 = vpow2.f32 %v1688_v53 }
 0x738   : > { %v4386_v24 = vpop.eup %3014  ;;  %3022 = vpow2.f32 %v2179_v0 }
 0x739   : > { %2795 = vmatpush3.bf16.msra.mxu0 %v1248_v34  ;;  %3024 = vpow2.f32 %v2181_v49 }
 0x73a   : > { %2796 = vmatprep.subr.bf16.mxu0 %v1250_v23  ;;  %v1206_v6 = vpop.xlane.xlu0 %1205  ;;  %3026 = vpow2.f32 %v2183_v55 }
 0x73b   : > { %3028 = vrcp.f32 %v4360_v17 }
 0x73c   : > { %3030 = vrcp.f32 %v4356_v58 }
 0x73d   : > { %2797 = vmatpush3.bf16.msra.mxu0 %v1250_v23 }
 0x73e   : > { %2798 = vmatprep.subr.bf16.mxu0 %v1252_v26  ;;  %v1208_v43 = vpop.xlane.xlu0 %1207 }
 0x73f   : > { %v4391_v54 = vpop.eup %3016 }
 0x740   : > { %v4394_v20 = vpop.eup %3018 }
 0x741   : > { %2799 = vmatpush3.bf16.msra.mxu0 %v1252_v26  ;;  %v4396_v50 = vpop.eup %3020 }
 0x742   : > { %v1210_v41 = vpop.xlane.xlu0 %1209  ;;  %v4401_v56 = vpop.eup %3022 }
 0x743   : > { %v4405_v59 = vpop.eup %3024  ;;  %3032 = vrcp.f32 %v1210_v41 }
 0x744   : > { %v4408_v5 = vpop.eup %3026  ;;  %3034 = vrcp.f32 %v1206_v6 }
 0x745   : > { %v3029_v9 = vpop.eup %3028  ;;  %3036 = vrcp.f32 %v1208_v43 }
 0x746   : > { %v1731_v11 = vpop.permute.xlu0 %1730  ;;  %v3031_v17 = vpop.eup %3030  ;;  %v1222_v57 = vmul.f32 %v3029_v9, %v4281_v15 }
 0x747   : > { %2810 = vmatprep.subr.bf16.mxu1 %v1731_v11  ;;  %v1221_v44 = vmul.f32 %v3031_v17, %v4278_v30 }
 0x748   : > { %1702 = vadd.xlane.f32.xlu0 %v4381_v27  ;;  %2811 = vmatpush3.bf16.msra.mxu1 %v1731_v11 }
 0x749   : > { %v1228_v34 = vpack.c.bf16 %v1222_v57, %v1221_v44 }
 0x74c   : > { %1706 = vadd.xlane.f32.xlu0 %v4386_v24 }
 0x74d   : > { %v3033_v33 = vpop.eup %3032 }
 0x74e   : > { %v3035_v22 = vpop.eup %3034  ;;  %v1226_v21 = vmul.f32 %v3033_v33, %v4297_v8 }
 0x74f   : > { %v3037_v26 = vpop.eup %3036  ;;  %v1224_v30 = vmul.f32 %v3035_v22, %v4289_v2 }
 0x750   : > { %1708 = vadd.xlane.f32.xlu0 %v4391_v54  ;;  %v1225_v25 = vmul.f32 %v3037_v26, %v4294_v7 }
 0x752   : > { %v1230_v28 = vpack.c.bf16 %v1226_v21, %v1225_v25 }
 0x754   : > { %2193 = vadd.xlane.f32.xlu0 %v4394_v20 }
 0x755   : > { %1704 = vadd.xlane.f32.xlu1 %v4396_v50 }
 0x759   : > { %2195 = vadd.xlane.f32.xlu1 %v4401_v56 }
 0x75d   : > { %2197 = vadd.xlane.f32.xlu1 %v4405_v59 }
 0x760   : > { %v1204_v35 = vpop.xlane.xlu1 %1203 }
 0x761   : > { %3038 = vrcp.f32 %v1204_v35  ;;  %2199 = vadd.xlane.f32.xlu1 %v4408_v5 }
 0x764   : > { %v1254_v58 = vpop.permute.xlu1 %1253 }
 0x765   : > { %2800 = vmatprep.subr.bf16.mxu0 %v1254_v58 }
 0x766   : > { %2801 = vmatpush3.bf16.msra.mxu0 %v1254_v58 }
 0x768   : > { %v2222_v29 = vpop.permute.xlu1 %2221 }
 0x769   : > { %2803 = vmatmul.mubr.bf16.vlgmr.msra.gmra.mrb[16].mxu0 %v1228_v34  ;;  %2834 = vmatprep.subr.bf16.mxu0 %v2222_v29 }
 0x76a   : > { %1736 = vrot.lane.b32.xlu0 %v4663_v13, %s3147_s13  ;;  %2835 = vmatpush3.bf16.msra.mxu0 %v2222_v29 }
 0x76b   : > { %v3039_v23 = vpop.eup %3038 }
 0x76c   : > { %v1223_v15 = vmul.f32 %v3039_v23, %v4303_v31 }
 0x76e   : > { %1738 = vrot.lane.b32.xlu0 %v4664_v60, %s3147_s13  ;;  %v1229_v6 = vpack.c.bf16 %v1224_v30, %v1223_v15 }
 0x770   : > { %2806 = vmatprep.mubr.bf16.mxu0 %v1229_v6 }
 0x771   : > { %2807 = vmatmul.mubr.bf16.gmra.mrb[20].mxu0 %v1230_v28 }
 0x772   : > { %1740 = vrot.lane.b32.xlu0 %v4667_v38, %s3147_s13  ;;  %2227 = vrot.lane.b32.xlu1 %v4663_v13, %s3149_s15 }
 0x776   : > { %1742 = vrot.lane.b32.xlu0 %v4665_v46, %s3147_s13  ;;  %2229 = vrot.lane.b32.xlu1 %v4664_v60, %s3149_s15 }
 0x77a   : > { %1744 = vrot.lane.b32.xlu0 %v4668_v12, %s3147_s13  ;;  %2231 = vrot.lane.b32.xlu1 %v4667_v38, %s3149_s15 }
 0x77e   : > { %2233 = vrot.lane.b32.xlu1 %v4665_v46, %s3149_s15 }
 0x782   : > { %2235 = vrot.lane.b32.xlu1 %v4668_v12, %s3149_s15 }
 0x794   : > { %v1697_v2 = vpop.xlane.xlu0 %1696 }
 0x795   : > { %3040 = vrcp.f32 %v1697_v2 }
 0x798   : > { %v1699_v13 = vpop.xlane.xlu0 %1698 }
 0x799   : > { %v1695_v7 = vpop.xlane.xlu1 %1694 }
 0x79a   : > { %3042 = vrcp.f32 %v1695_v7 }
 0x79b   : > { %3044 = vrcp.f32 %v1699_v13 }
 0x79c   : > { %v2186_v8 = vpop.xlane.xlu0 %2185 }
 0x79d   : > { %v1701_v60 = vpop.xlane.xlu1 %1700 }
 0x79e   : > { %3046 = vrcp.f32 %v1701_v60 }
 0x79f   : > { %3048 = vrcp.f32 %v2186_v8  ;;  %v3041_v38 = vpop.eup %3040 }
 0x7a0   : > { %v1733_v31 = vpop.permute.xlu0 %1732  ;;  %v1719_v3 = vmul.f32 %v3041_v38, %v4325_v62 }
 0x7a1   : > { %2812 = vmatprep.subr.bf16.mxu1 %v1733_v31  ;;  %v2188_v4 = vpop.xlane.xlu1 %2187 }
 0x7a2   : > { %3050 = vrcp.f32 %v2188_v4  ;;  %2813 = vmatpush3.bf16.msra.mxu1 %v1733_v31 }
 0x7a4   : > { %v3043_v46 = vpop.eup %3042  ;;  %v1735_v43 = vpop.permute.xlu0 %1734 }
 0x7a5   : > { %2814 = vmatprep.subr.bf16.mxu1 %v1735_v43  ;;  %v2190_v12 = vpop.xlane.xlu1 %2189  ;;  %v1718_v61 = vmul.f32 %v3043_v46, %v4333_v45  ;;  %v3045_v41 = vpop.eup %3044 }
 0x7a6   : > { %2815 = vmatpush3.bf16.msra.mxu1 %v1735_v43  ;;  %3052 = vrcp.f32 %v2190_v12  ;;  %v4440_v11 = vmul.f32 %v3045_v41, %v4331_v48 }
 0x7a7   : > { %v1726_v53 = vpack.c.bf16 %v1719_v3, %v1718_v61 }
 0x7a8   : > { %v3047_v19 = vpop.eup %3046 }
 0x7a9   : > { %v4443_v36 = vmul.f32 %v3047_v19, %v4339_v32  ;;  %2826 = vmatprep.mubr.bf16.mxu1 %v1726_v53  ;;  %v2192_v0 = vpop.xlane.xlu1 %2191  ;;  %v3049_v18 = vpop.eup %3048 }
 0x7aa   : > { %3054 = vrcp.f32 %v2192_v0  ;;  %v2209_v55 = vmul.f32 %v3049_v18, %v4337_v37 }
 0x7ab   : > { %v1727_v45 = vpack.c.bf16 %v4443_v36, %v4440_v11 }
 0x7ac   : > { %v3051_v49 = vpop.eup %3050 }
 0x7ad   : > { %v2224_v62 = vpop.permute.xlu1 %2223  ;;  %v2210_v9 = vmul.f32 %v3051_v49, %v4345_v47 }
 0x7ae   : > { %2836 = vmatprep.subr.bf16.mxu0 %v2224_v62 }
 0x7af   : > { %2837 = vmatpush3.bf16.msra.mxu0 %v2224_v62  ;;  %v2217_v48 = vpack.c.bf16 %v2210_v9, %v2209_v55 }
 0x7b0   : > { %v3053_v32 = vpop.eup %3052 }
 0x7b1   : > { %2850 = vmatprep.mubr.bf16.mxu0 %v2217_v48  ;;  %v2226_v35 = vpop.permute.xlu1 %2225  ;;  %v4450_v57 = vmul.f32 %v3053_v32, %v4350_v63 }
 0x7b2   : > { %2838 = vmatprep.subr.bf16.mxu0 %v2226_v35 }
 0x7b3   : > { %2839 = vmatpush3.bf16.msra.mxu0 %v2226_v35 }
 0x7b4   : > { %v3055_v17 = vpop.eup %3054 }
 0x7b5   : > { %v4453_v58 = vmul.f32 %v3055_v17, %v4353_v40 }
 0x7b7   : > { %v2218_v37 = vpack.c.bf16 %v4453_v58, %v4450_v57 }
 0x7d5   : > { %v1703_v44 = vpop.xlane.xlu0 %1702 }
 0x7d9   : > { %v1707_v47 = vpop.xlane.xlu0 %1706 }
 0x7dd   : > { %v1709_v34 = vpop.xlane.xlu0 %1708 }
 0x7e1   : > { %v2194_v33 = vpop.xlane.xlu0 %2193 }
 0x7e2   : > { %v1705_v29 = vpop.xlane.xlu1 %1704 }
 0x7e3   : > { %3056 = vrcp.f32 %v1705_v29 }
 0x7e4   : > { %3058 = vrcp.f32 %v1703_v44 }
 0x7e5   : > { %v1737_v22 = vpop.permute.xlu0 %1736  ;;  %3060 = vrcp.f32 %v1709_v34 }
 0x7e6   : > { %2816 = vmatprep.subr.bf16.mxu1 %v1737_v22  ;;  %v2196_v26 = vpop.xlane.xlu1 %2195  ;;  %3062 = vrcp.f32 %v1707_v47 }
 0x7e7   : > { %2817 = vmatpush3.bf16.msra.mxu1 %v1737_v22  ;;  %3064 = vrcp.f32 %v2196_v26 }
 0x7e8   : > { %3066 = vrcp.f32 %v2194_v33 }
 0x7e9   : > { %v1739_v23 = vpop.permute.xlu0 %1738 }
 0x7ea   : > { %2818 = vmatprep.subr.bf16.mxu1 %v1739_v23  ;;  %v2198_v63 = vpop.xlane.xlu1 %2197 }
 0x7eb   : > { %2819 = vmatpush3.bf16.msra.mxu1 %v1739_v23 }
 0x7ed   : > { %v1741_v40 = vpop.permute.xlu0 %1740  ;;  %v3057_v30 = vpop.eup %3056 }
 0x7ee   : > { %2820 = vmatprep.subr.bf16.mxu1 %v1741_v40  ;;  %v2200_v21 = vpop.xlane.xlu1 %2199  ;;  %v3059_v6 = vpop.eup %3058  ;;  %v1723_v2 = vmul.f32 %v3057_v30, %v4396_v50 }
 0x7ef   : > { %2821 = vmatpush3.bf16.msra.mxu1 %v1741_v40  ;;  %v1722_v7 = vmul.f32 %v3059_v6, %v4381_v27  ;;  %v3061_v8 = vpop.eup %3060  ;;  %3068 = vrcp.f32 %v2200_v21 }
 0x7f0   : > { %v3063_v4 = vpop.eup %3062  ;;  %v1725_v38 = vmul.f32 %v3061_v8, %v4391_v54  ;;  %3070 = vrcp.f32 %v2198_v63 }
 0x7f1   : > { %v1743_v15 = vpop.permute.xlu0 %1742  ;;  %v1728_v60 = vpack.c.bf16 %v1723_v2, %v1722_v7  ;;  %v1724_v46 = vmul.f32 %v3063_v4, %v4386_v24  ;;  %v3065_v43 = vpop.eup %3064 }
 0x7f2   : > { %2822 = vmatprep.subr.bf16.mxu1 %v1743_v15  ;;  %v2228_v25 = vpop.permute.xlu1 %2227  ;;  %v3067_v12 = vpop.eup %3066  ;;  %v2214_v3 = vmul.f32 %v3065_v43, %v4401_v56 }
 0x7f3   : > { %2823 = vmatpush3.bf16.msra.mxu1 %v1743_v15  ;;  %2840 = vmatprep.subr.bf16.mxu0 %v2228_v25  ;;  %v1729_v27 = vpack.c.bf16 %v1725_v38, %v1724_v46  ;;  %v2213_v41 = vmul.f32 %v3067_v12, %v4394_v20 }
 0x7f4   : > { %2841 = vmatpush3.bf16.msra.mxu0 %v2228_v25 }
 0x7f5   : > { %v1745_v28 = vpop.permute.xlu0 %1744  ;;  %v2219_v19 = vpack.c.bf16 %v2214_v3, %v2213_v41 }
 0x7f6   : > { %2824 = vmatprep.subr.bf16.mxu1 %v1745_v28  ;;  %v2230_v13 = vpop.permute.xlu1 %2229 }
 0x7f7   : > { %2825 = vmatpush3.bf16.msra.mxu1 %v1745_v28  ;;  %2842 = vmatprep.subr.bf16.mxu0 %v2230_v13 }
 0x7f8   : > { %2843 = vmatpush3.bf16.msra.mxu0 %v2230_v13 }
 0x7f9   : > { %v3069_v53 = vpop.eup %3068 }
 0x7fa   : > { %2827 = vmatmul.mubr.bf16.vlgmr.msra.gmra.mrb[8].mxu1 %v1727_v45  ;;  %v2232_v31 = vpop.permute.xlu1 %2231  ;;  %v3071_v24 = vpop.eup %3070  ;;  %v2216_v54 = vmul.f32 %v3069_v53, %v4408_v5 }
 0x7fb   : > { %2830 = vmatprep.mubr.bf16.mxu1 %v1728_v60  ;;  %2844 = vmatprep.subr.bf16.mxu0 %v2232_v31  ;;  %v2215_v11 = vmul.f32 %v3071_v24, %v4405_v59 }
 0x7fc   : > { %2845 = vmatpush3.bf16.msra.mxu0 %v2232_v31 }
 0x7fd   : > { %v2220_v36 = vpack.c.bf16 %v2216_v54, %v2215_v11 }
 0x7fe   : > { %v2234_v50 = vpop.permute.xlu1 %2233 }
 0x7ff   : > { %2846 = vmatprep.subr.bf16.mxu0 %v2234_v50 }
 0x800   : > { %2847 = vmatpush3.bf16.msra.mxu0 %v2234_v50 }
 0x802   : > { %2831 = vmatmul.mubr.bf16.gmra.mrb[12].mxu1 %v1729_v27  ;;  %v2236_v61 = vpop.permute.xlu1 %2235 }
 0x803   : > { %2848 = vmatprep.subr.bf16.mxu0 %v2236_v61 }
 0x804   : > { %2849 = vmatpush3.bf16.msra.mxu0 %v2236_v61 }
 0x807   : > { %2851 = vmatmul.mubr.bf16.vlgmr.msra.gmra.mrb[24].mxu0 %v2218_v37 }
 0x808   : > { %2854 = vmatprep.mubr.bf16.mxu0 %v2219_v19 }
 0x80f   : > { %2855 = vmatmul.mubr.bf16.gmra.mrb[28].mxu0 %v2220_v36 }
 0x83c   : > { %v2804_v0 = vpop.f32.mrb[16].mxu0 }
 0x83d   : > { %v1340_v56 = vmul.f32 1.442695, %v2804_v0  ;;  %v1297_v18 = vpop.f32.mrb[17].mxu0  ;;  %vm1330_vm4 = vcmp.gt.f32.partialorder %v2804_v0, 0.0 }
 0x83e   : > { %v1336_v45 = vmul.f32 1.442695, %v1297_v18  ;;  %v2805_v49 = vpop.f32.mrb[18].mxu0  ;;  %vm1328_vm6 = vcmp.gt.f32.partialorder %v1297_v18, 0.0 }
 0x83f   : > { %3072 = vpow2.f32 %v1340_v56  ;;  %v1342_v20 = vmul.f32 1.442695, %v2805_v49  ;;  %v1300_v62 = vpop.f32.mrb[19].mxu0  ;;  %vm1331_vm5 = vcmp.gt.f32.partialorder %v2805_v49, 0.0 }
 0x840   : > { %3074 = vpow2.f32 %v1336_v45  ;;  %v1338_v55 = vmul.f32 1.442695, %v1300_v62  ;;  %vm1329_vm7 = vcmp.gt.f32.partialorder %v1300_v62, 0.0 }
 0x841   : > { %3076 = vpow2.f32 %v1342_v20 }
 0x842   : > { %3078 = vpow2.f32 %v1338_v55 }
 0x844   : > { %v2808_v9 = vpop.f32.mrb[20].mxu0 }
 0x845   : > { %v1348_v48 = vmul.f32 1.442695, %v2808_v9  ;;  %v1313_v35 = vpop.f32.mrb[21].mxu0  ;;  %vm1334_vm8 = vcmp.gt.f32.partialorder %v2808_v9, 0.0 }
 0x846   : > { %v1344_v5 = vmul.f32 1.442695, %v1313_v35  ;;  %v2809_v32 = vpop.f32.mrb[22].mxu0  ;;  %vm1332_vm10 = vcmp.gt.f32.partialorder %v1313_v35, 0.0 }
 0x847   : > { %3080 = vpow2.f32 %v1348_v48  ;;  %v1350_v59 = vmul.f32 1.442695, %v2809_v32  ;;  %v1316_v17 = vpop.f32.mrb[23].mxu0  ;;  %vm1335_vm9 = vcmp.gt.f32.partialorder %v2809_v32, 0.0 }
 0x848   : > { %3082 = vpow2.f32 %v1344_v5  ;;  %v1346_v57 = vmul.f32 1.442695, %v1316_v17  ;;  %vm1333_vm11 = vcmp.gt.f32.partialorder %v1316_v17, 0.0 }
 0x849   : > { %v3073_v58 = vpop.eup %3072  ;;  %3084 = vpow2.f32 %v1350_v59 }
 0x84a   : > { %v3075_v37 = vpop.eup %3074  ;;  %v2615_v44 = vadd.f32 -1.0, %v3073_v58  ;;  %3086 = vpow2.f32 %v1346_v57 }
 0x84b   : > { %v3077_v47 = vpop.eup %3076  ;;  %v2613_v34 = vadd.f32 -1.0, %v3075_v37 }
 0x84c   : > { %v3079_v33 = vpop.eup %3078  ;;  %v2616_v29 = vadd.f32 -1.0, %v3077_v47  ;;  %v1362_v26 = vsel %vm1330_vm4, %v2804_v0, %v2615_v44 }
 0x84d   : > { %v2614_v22 = vadd.f32 -1.0, %v3079_v33  ;;  %v1360_v63 = vsel %vm1328_vm6, %v1297_v18, %v2613_v34 }
 0x84e   : > { %v1363_v23 = vsel %vm1331_vm5, %v2805_v49, %v2616_v29 }
 0x84f   : > { %v2877_v40 = vpack.i.bf16 %v1363_v23, %v1362_v26  ;;  %v1361_v21 = vsel %vm1329_vm7, %v1300_v62, %v2614_v22 }
 0x850   : > { %v2872_v15 = vpack.i.bf16 %v1361_v21, %v1360_v63 }
 0x851   : > { %v3081_v30 = vpop.eup %3080  ;;  %2878 = vrot.lane.b32.xlu1 %v2877_v40, %s3144_s9 }
 0x852   : > { %v3083_v25 = vpop.eup %3082  ;;  %v2619_v6 = vadd.f32 -1.0, %v3081_v30  ;;  %2873 = vrot.lane.b32.xlu0 %v2872_v15, %s3144_s9 }
 0x853   : > { %v3085_v28 = vpop.eup %3084  ;;  %v2617_v2 = vadd.f32 -1.0, %v3083_v25 }
 0x854   : > { %v3087_v13 = vpop.eup %3086  ;;  %v2620_v7 = vadd.f32 -1.0, %v3085_v28  ;;  %v1366_v60 = vsel %vm1334_vm8, %v2808_v9, %v2619_v6 }
 0x855   : > { %v2618_v8 = vadd.f32 -1.0, %v3087_v13  ;;  %v1364_v4 = vsel %vm1332_vm10, %v1313_v35, %v2617_v2 }
 0x856   : > { %v1367_v31 = vsel %vm1335_vm9, %v2809_v32, %v2620_v7 }
 0x857   : > { %v2887_v38 = vpack.i.bf16 %v1367_v31, %v1366_v60  ;;  %v1365_v50 = vsel %vm1333_vm11, %v1316_v17, %v2618_v8 }
 0x858   : > { %v2882_v46 = vpack.i.bf16 %v1365_v50, %v1364_v4 }
 0x859   : > { %2888 = vrot.lane.b32.xlu1 %v2887_v38, %s3144_s9 }
 0x85a   : > { %2883 = vrot.lane.b32.xlu0 %v2882_v46, %s3144_s9 }
 0x8cd   : > { %v2828_v43 = vpop.f32.mrb[8].mxu1 }
 0x8ce   : > { %v1831_v27 = vmul.f32 1.442695, %v2828_v43  ;;  %v1788_v12 = vpop.f32.mrb[9].mxu1  ;;  %vm1821_vm12 = vcmp.gt.f32.partialorder %v2828_v43, 0.0 }
 0x8cf   : > { %v1827_v61 = vmul.f32 1.442695, %v1788_v12  ;;  %v2829_v3 = vpop.f32.mrb[10].mxu1  ;;  %vm1819_vm13 = vcmp.gt.f32.partialorder %v1788_v12, 0.0 }
 0x8d0   : > { %3088 = vpow2.f32 %v1831_v27  ;;  %v1833_v41 = vmul.f32 1.442695, %v2829_v3  ;;  %v1791_v53 = vpop.f32.mrb[11].mxu1  ;;  %vm1822_vm14 = vcmp.gt.f32.partialorder %v2829_v3, 0.0 }
 0x8d1   : > { %3090 = vpow2.f32 %v1827_v61  ;;  %v1829_v19 = vmul.f32 1.442695, %v1791_v53  ;;  %vm1820_vm15 = vcmp.gt.f32.partialorder %v1791_v53, 0.0 }
 0x8d2   : > { %3092 = vpow2.f32 %v1833_v41 }
 0x8d3   : > { %3094 = vpow2.f32 %v1829_v19 }
 0x8d5   : > { %v4472_v24 = vpop.f32.mrb[12].mxu1 }
 0x8d6   : > { %v1839_v54 = vmul.f32 1.442695, %v4472_v24  ;;  %v4475_v11 = vpop.f32.mrb[13].mxu1  ;;  %vm1825_vm0 = vcmp.gt.f32.partialorder %v4472_v24, 0.0 }
 0x8d7   : > { %v1835_v36 = vmul.f32 1.442695, %v4475_v11  ;;  %v4478_v0 = vpop.f32.mrb[14].mxu1  ;;  %vm1823_vm2 = vcmp.gt.f32.partialorder %v4475_v11, 0.0 }
 0x8d8   : > { %3096 = vpow2.f32 %v1839_v54  ;;  %v1841_v56 = vmul.f32 1.442695, %v4478_v0  ;;  %v4481_v18 = vpop.f32.mrb[15].mxu1  ;;  %vm1826_vm3 = vcmp.gt.f32.partialorder %v4478_v0, 0.0 }
 0x8d9   : > { %3098 = vpow2.f32 %v1835_v36  ;;  %v1837_v45 = vmul.f32 1.442695, %v4481_v18  ;;  %vm1824_vm4 = vcmp.gt.f32.partialorder %v4481_v18, 0.0 }
 0x8da   : > { %v3089_v49 = vpop.eup %3088  ;;  %3100 = vpow2.f32 %v1841_v56  ;;  %v4484_v20 = vpop.f32.mrb[24].mxu0 }
 0x8db   : > { %v3091_v62 = vpop.eup %3090  ;;  %v2625_v55 = vadd.f32 -1.0, %v3089_v49  ;;  %3102 = vpow2.f32 %v1837_v45  ;;  %v2322_v9 = vmul.f32 1.442695, %v4484_v20  ;;  %v4487_v48 = vpop.f32.mrb[25].mxu0  ;;  %vm2312_vm5 = vcmp.gt.f32.partialorder %v4484_v20, 0.0 }
 0x8dc   : > { %v3093_v35 = vpop.eup %3092  ;;  %v2623_v5 = vadd.f32 -1.0, %v3091_v62  ;;  %v2318_v32 = vmul.f32 1.442695, %v4487_v48  ;;  %v4490_v59 = vpop.f32.mrb[26].mxu0  ;;  %vm2310_vm7 = vcmp.gt.f32.partialorder %v4487_v48, 0.0 }
 0x8dd   : > { %v3095_v17 = vpop.eup %3094  ;;  %v2626_v57 = vadd.f32 -1.0, %v3093_v35  ;;  %3104 = vpow2.f32 %v2322_v9  ;;  %v4492_v58 = vpop.f32.mrb[27].mxu0  ;;  %v2324_v44 = vmul.f32 1.442695, %v4490_v59  ;;  %v1853_v47 = vsel %vm1821_vm12, %v2828_v43, %v2625_v55 }
 0x8de   : > { %v2624_v37 = vadd.f32 -1.0, %v3095_v17  ;;  %3106 = vpow2.f32 %v2318_v32  ;;  %v2320_v33 = vmul.f32 1.442695, %v4492_v58  ;;  %v1851_v29 = vsel %vm1819_vm13, %v1788_v12, %v2623_v5 }
 0x8df   : > { %v1854_v34 = vsel %vm1822_vm14, %v2829_v3, %v2626_v57  ;;  %3108 = vpow2.f32 %v2324_v44  ;;  %vm2313_vm6 = vcmp.gt.f32.partialorder %v4490_v59, 0.0  ;;  %vm2311_vm8 = vcmp.gt.f32.partialorder %v4492_v58, 0.0 }
 0x8e0   : > { %v2897_v22 = vpack.i.bf16 %v1854_v34, %v1853_v47  ;;  %v1852_v26 = vsel %vm1820_vm15, %v1791_v53, %v2624_v37  ;;  %3110 = vpow2.f32 %v2320_v33  ;;  %v841_v34 = vmul.f32 1.442695, %v4156_v52 }
 0x8e1   : > { %v2892_v23 = vpack.i.bf16 %v1852_v26, %v1851_v29  ;;  %v837_v33 = vmul.f32 1.442695, %v4158_v14  ;;  %v843_v29 = vmul.f32 1.442695, %v4163_v39  ;;  %v849_v26 = vmul.f32 1.442695, %v4180_v16 }
 0x8e2   : > { %v3097_v63 = vpop.eup %3096  ;;  %2898 = vrot.lane.b32.xlu1 %v2897_v22, %s3145_s10  ;;  %v4497_v40 = vpop.f32.mrb[28].mxu0  ;;  %v839_v22 = vmul.f32 1.442695, %v4165_v1  ;;  %vm831_vm13 = vcmp.gt.f32.partialorder %v4156_v52, 0.0  ;;  %vm829_vm14 = vcmp.gt.f32.partialorder %v4158_v14, 0.0  ;;  %vm832_vm15 = vcmp.gt.f32.partialorder %v4163_v39, 0.0 }
 0x8e3   : > { %v3099_v21 = vpop.eup %3098  ;;  %v2629_v15 = vadd.f32 -1.0, %v3097_v63  ;;  %v2330_v30 = vmul.f32 1.442695, %v4497_v40  ;;  %2893 = vrot.lane.b32.xlu0 %v2892_v23, %s3145_s10  ;;  %v2295_v25 = vpop.f32.mrb[29].mxu0  ;;  %vm2316_vm9 = vcmp.gt.f32.partialorder %v4497_v40, 0.0 }
 0x8e4   : > { %v3101_v6 = vpop.eup %3100  ;;  %v2627_v28 = vadd.f32 -1.0, %v3099_v21  ;;  %v2326_v2 = vmul.f32 1.442695, %v2295_v25  ;;  %v2857_v13 = vpop.f32.mrb[30].mxu0  ;;  %vm2314_vm11 = vcmp.gt.f32.partialorder %v2295_v25, 0.0 }
 0x8e5   : > { %v3103_v7 = vpop.eup %3102  ;;  %v2630_v8 = vadd.f32 -1.0, %v3101_v6  ;;  %3112 = vpow2.f32 %v2330_v30  ;;  %v2298_v60 = vpop.f32.mrb[31].mxu0  ;;  %v2332_v4 = vmul.f32 1.442695, %v2857_v13  ;;  %v1857_v50 = vsel %vm1825_vm0, %v4472_v24, %v2629_v15 }
 0x8e6   : > { %v2628_v31 = vadd.f32 -1.0, %v3103_v7  ;;  %3114 = vpow2.f32 %v2326_v2  ;;  %v2328_v43 = vmul.f32 1.442695, %v2298_v60  ;;  %v1855_v12 = vsel %vm1823_vm2, %v4475_v11, %v2627_v28  ;;  %v2879_v21 = vpop.permute.xlu1 %2878  ;;  %v2874_v15 = vpop.permute.xlu0 %2873 }
 0x8e7   : > { %v3105_v38 = vpop.eup %3104  ;;  %v1858_v46 = vsel %vm1826_vm3, %v4478_v0, %v2630_v8  ;;  %3116 = vpow2.f32 %v2332_v4  ;;  %vm2317_vm10 = vcmp.gt.f32.partialorder %v2857_v13, 0.0  ;;  %vm2315_vm12 = vcmp.gt.f32.partialorder %v2298_v60, 0.0 }
 0x8e8   : > { %v3107_v27 = vpop.eup %3106  ;;  %v2907_v61 = vpack.i.bf16 %v1858_v46, %v1857_v50  ;;  %v1856_v3 = vsel %vm1824_vm4, %v4481_v18, %v2628_v31  ;;  %v2635_v53 = vadd.f32 -1.0, %v3105_v38  ;;  %3118 = vpow2.f32 %v2328_v43 }
 0x8e9   : > { %v2902_v41 = vpack.i.bf16 %v1856_v3, %v1855_v12  ;;  %v3109_v19 = vpop.eup %3108  ;;  %v2633_v54 = vadd.f32 -1.0, %v3107_v27  ;;  %3120 = vpow2.f32 %v841_v34  ;;  %v845_v23 = vmul.f32 1.442695, %v4182_v42 }
 0x8ea   : > { %2908 = vrot.lane.b32.xlu1 %v2907_v61, %s3145_s10  ;;  %v3111_v24 = vpop.eup %3110  ;;  %v2636_v36 = vadd.f32 -1.0, %v3109_v19  ;;  %v2344_v0 = vsel %vm2312_vm5, %v4484_v20, %v2635_v53  ;;  %3122 = vpow2.f32 %v837_v33  ;;  %v851_v63 = vmul.f32 1.442695, %v4186_v51  ;;  %v4533_v30 = vpop.permute.xlu1 %2888 }
 0x8eb   : > { %2903 = vrot.lane.b32.xlu0 %v2902_v41, %s3145_s10  ;;  %v2634_v11 = vadd.f32 -1.0, %v3111_v24  ;;  %v2342_v18 = vsel %vm2310_vm7, %v4487_v48, %v2633_v54  ;;  %3124 = vpow2.f32 %v843_v29  ;;  %v4535_v6 = vpop.permute.xlu0 %2883  ;;  %vm830_vm0 = vcmp.gt.f32.partialorder %v4165_v1, 0.0 }
 0x8ec   : > { %v2345_v56 = vsel %vm2313_vm6, %v4490_v59, %v2636_v36  ;;  %3126 = vpow2.f32 %v839_v22  ;;  %v2881_v3 = vunpack.i.h.bf16 %v2879_v21  ;;  %v2880_v41 = vunpack.i.l.bf16 %v2879_v21 }
 0x8ed   : > { %v2917_v45 = vpack.i.bf16 %v2345_v56, %v2344_v0  ;;  %v2343_v49 = vsel %vm2311_vm8, %v4492_v58, %v2634_v11  ;;  %3128 = vpow2.f32 %v849_v26  ;;  %v2876_v24 = vunpack.i.h.bf16 %v2874_v15 }
 0x8ee   : > { %v2912_v55 = vpack.i.bf16 %v2343_v49, %v2342_v18  ;;  %3130 = vpow2.f32 %v845_v23  ;;  %v2875_v36 = vunpack.i.l.bf16 %v2874_v15  ;;  %vm835_vm2 = vcmp.gt.f32.partialorder %v4180_v16, 0.0 }
 0x8ef   : > { %v3113_v62 = vpop.eup %3112  ;;  %2918 = vrot.lane.b32.xlu1 %v2917_v45, %s3146_s25  ;;  %3132 = vpow2.f32 %v851_v63  ;;  %vm2454_vm3 = vcmask 261120   ;;  %vm833_vm4 = vcmp.gt.f32.partialorder %v4182_v42, 0.0  ;;  %vm2463_vm5 = vcmask 392192  }
 0x8f0   : > { %v3115_v9 = vpop.eup %3114  ;;  %v2639_v35 = vadd.f32 -1.0, %v3113_v62  ;;  %2913 = vrot.lane.b32.xlu0 %v2912_v55, %s3146_s25  ;;  %vm2504_vm6 = vcmask 519168   ;;  %v2886_v63 = vunpack.i.h.bf16 %v4535_v6  ;;  %vm836_vm7 = vcmp.gt.f32.partialorder %v4186_v51, 0.0 }
 0x8f1   : > { %v3117_v20 = vpop.eup %3116  ;;  %v2637_v5 = vadd.f32 -1.0, %v3115_v9  ;;  %vm834_vm8 = vcmp.gt.f32.partialorder %v4188_v10, 0.0 }
 0x8f2   : > { %v3119_v32 = vpop.eup %3118  ;;  %v2640_v17 = vadd.f32 -1.0, %v3117_v20  ;;  %v2348_v48 = vsel %vm2316_vm9, %v4497_v40, %v2639_v35  ;;  %v847_v40 = vmul.f32 1.442695, %v4188_v10  ;;  %v2891_v35 = vunpack.i.h.bf16 %v4533_v30 }
 0x8f3   : > { %v2638_v59 = vadd.f32 -1.0, %v3119_v32  ;;  %v2346_v58 = vsel %vm2314_vm11, %v2295_v25, %v2637_v5  ;;  %v3121_v25 = vpop.eup %3120  ;;  %v2890_v5 = vunpack.i.l.bf16 %v4533_v30 }
 0x8f4   : > { %v2349_v57 = vsel %vm2317_vm10, %v2857_v13, %v2640_v17  ;;  %3134 = vpow2.f32 %v847_v40  ;;  %v3123_v28 = vpop.eup %3122  ;;  %v2605_v8 = vadd.f32 -1.0, %v3121_v25  ;;  %v2885_v40 = vunpack.i.l.bf16 %v4535_v6 }
 0x8f5   : > { %v2927_v37 = vpack.i.bf16 %v2349_v57, %v2348_v48  ;;  %v2347_v44 = vsel %vm2315_vm12, %v2298_v60, %v2638_v59  ;;  %v3125_v2 = vpop.eup %3124  ;;  %v2603_v4 = vadd.f32 -1.0, %v3123_v28 }
 0x8f6   : > { %v2922_v47 = vpack.i.bf16 %v2347_v44, %v2346_v58  ;;  %v3127_v13 = vpop.eup %3126  ;;  %v2606_v38 = vadd.f32 -1.0, %v3125_v2  ;;  %v863_v61 = vsel %vm831_vm13, %v4156_v52, %v2605_v8 }
 0x8f7   : > { %2928 = vrot.lane.b32.xlu1 %v2927_v37, %s3146_s25  ;;  %v3129_v31 = vpop.eup %3128  ;;  %v2604_v46 = vadd.f32 -1.0, %v3127_v13  ;;  %v861_v19 = vsel %vm829_vm14, %v4158_v14, %v2603_v4  ;;  %v2448_v14 = vsel %vm511_vm1, %v863_v61, %v2880_v41 }
 0x8f8   : > { %2923 = vrot.lane.b32.xlu0 %v2922_v47, %s3146_s25  ;;  %v3131_v50 = vpop.eup %3130  ;;  %v864_v54 = vsel %vm832_vm15, %v4163_v39, %v2606_v38  ;;  %v2609_v0 = vadd.f32 -1.0, %v3129_v31  ;;  %v2446_v9 = vsel %vm511_vm1, %v861_v19, %v2875_v36  ;;  %s4564_s25 = scalar_lea.vmem %s4624_s5, %s2577_s19 }
 0x8f9   : > { %v3133_v43 = vpop.eup %3132  ;;  %v862_v11 = vsel %vm830_vm0, %v4165_v1, %v2604_v46  ;;  %v2607_v56 = vadd.f32 -1.0, %v3131_v50  ;;  %v2449_v62 = vsel %vm511_vm1, %v864_v54, %v2881_v3 }
 0x8fa   : > { %v2610_v18 = vadd.f32 -1.0, %v3133_v43  ;;  %v2447_v1 = vsel %vm511_vm1, %v862_v11, %v2876_v24  ;;  %v867_v28 = vsel %vm835_vm2, %v4180_v16, %v2609_v0 }
 0x8fb   : > { %v2452_v16 = vsel %vm511_vm1, %v867_v28, %v2890_v5 }
 0x8fc   : > { %v868_v6 = vsel %vm836_vm7, %v4186_v51, %v2610_v18 }
 0x8fe   : > { %v3135_v12 = vpop.eup %3134 }
 0x8ff   : > { %v2608_v52 = vadd.f32 -1.0, %v3135_v12 }
 0x901   : > { %v866_v8 = vsel %vm834_vm8, %v4188_v10, %v2608_v52 }
 0x902   : > { %v2451_v51 = vsel %vm511_vm1, %v866_v8, %v2886_v63 }
 0x954   : > { %v2899_v7 = vpop.permute.xlu1 %2898 }
 0x955   : > { %v2894_v60 = vpop.permute.xlu0 %2893  ;;  %v2901_v45 = vunpack.i.h.bf16 %v2899_v7  ;;  %v2900_v49 = vunpack.i.l.bf16 %v2899_v7  ;;  %v865_v7 = vsel %vm833_vm4, %v4182_v42, %v2607_v56 }
 0x956   : > { %v2896_v39 = vunpack.i.h.bf16 %v2894_v60  ;;  %v2895_v55 = vunpack.i.l.bf16 %v2894_v60  ;;  %v2453_v60 = vsel %vm511_vm1, %v868_v6, %v2891_v35  ;;  %v2450_v4 = vsel %vm511_vm1, %v865_v7, %v2885_v40 }
 0x957   : > { %v2457_v48 = vsel %vm2454_vm3, %v2448_v14, %v2900_v49  ;;  %v2458_v57 = vsel %vm2454_vm3, %v2449_v62, %v2901_v45 }
 0x958   : > { %v2456_v44 = vsel %vm2454_vm3, %v2447_v1, %v2896_v39  ;;  %v2455_v47 = vsel %vm2454_vm3, %v2446_v9, %v2895_v55 }
 0x95c   : > { %v4540_v27 = vpop.permute.xlu1 %2908 }
 0x95d   : > { %v4544_v53 = vpop.permute.xlu0 %2903  ;;  %v2911_v30 = vunpack.i.h.bf16 %v4540_v27  ;;  %v2910_v25 = vunpack.i.l.bf16 %v4540_v27 }
 0x95e   : > { %v2906_v2 = vunpack.i.h.bf16 %v4544_v53  ;;  %v2905_v13 = vunpack.i.l.bf16 %v4544_v53 }
 0x95f   : > { %v2461_v43 = vsel %vm2454_vm3, %v2452_v16, %v2910_v25  ;;  %v2462_v42 = vsel %vm2454_vm3, %v2453_v60, %v2911_v30 }
 0x960   : > { %v2460_v12 = vsel %vm2454_vm3, %v2451_v51, %v2906_v2  ;;  %v2459_v61 = vsel %vm2454_vm3, %v2450_v4, %v2905_v13 }
 0x961   : > { %v2919_v20 = vpop.permute.xlu1 %2918 }
 0x962   : > { %v2921_v32 = vunpack.i.h.bf16 %v2919_v20  ;;  %v2920_v17 = vunpack.i.l.bf16 %v2919_v20  ;;  %v2914_v59 = vpop.permute.xlu0 %2913 }
 0x963   : > { %v2916_v58 = vunpack.i.h.bf16 %v2914_v59  ;;  %v2915_v37 = vunpack.i.l.bf16 %v2914_v59 }
 0x964   : > { %v2466_v34 = vsel %vm2463_vm5, %v2457_v48, %v2920_v17  ;;  %v2467_v33 = vsel %vm2463_vm5, %v2458_v57, %v2921_v32 }
 0x965   : > { %v2653_v29 = vpack.c.bf16 %v2466_v34, %v2466_v34  ;;  %v2654_v22 = vpack.c.bf16 %v2467_v33, %v2467_v33  ;;  %v2465_v26 = vsel %vm2463_vm5, %v2456_v44, %v2916_v58  ;;  %v2464_v23 = vsel %vm2463_vm5, %v2455_v47, %v2915_v37 }
 0x966   : > { %v2652_v21 = vpack.c.bf16 %v2465_v26, %v2465_v26  ;;  %v2651_v15 = vpack.c.bf16 %v2464_v23, %v2464_v23 }
 0x967   : > { %2507 = vst.msk [vmem:[%s4564_s25 + $0x8] sm:$0xf] %vm2504_vm6, %v2653_v29  ;;  %2508 = vst.msk [vmem:[%s4564_s25 + $0xc] sm:$0xf] %vm2504_vm6, %v2654_v22 }
 0x968   : > { %2506 = vst.msk [vmem:[%s4564_s25 + $0x4] sm:$0xf] %vm2504_vm6, %v2652_v21  ;;  %2505 = vst.msk [vmem:[%s4564_s25] sm:$0xf] %vm2504_vm6, %v2651_v15 }
 0x969   : > { %v2929_v31 = vpop.permute.xlu1 %2928 }
 0x96a   : > { %v2931_v38 = vunpack.i.h.bf16 %v2929_v31  ;;  %v2930_v50 = vunpack.i.l.bf16 %v2929_v31  ;;  %v2924_v46 = vpop.permute.xlu0 %2923 }
 0x96b   : > { %v2926_v10 = vunpack.i.h.bf16 %v2924_v46  ;;  %v2925_v27 = vunpack.i.l.bf16 %v2924_v46 }
 0x96c   : > { %v2470_v3 = vsel %vm2463_vm5, %v2461_v43, %v2930_v50  ;;  %v2471_v41 = vsel %vm2463_vm5, %v2462_v42, %v2931_v38 }
 0x96d   : > { %v2657_v53 = vpack.c.bf16 %v2470_v3, %v2470_v3  ;;  %v2658_v19 = vpack.c.bf16 %v2471_v41, %v2471_v41  ;;  %v2469_v54 = vsel %vm2463_vm5, %v2460_v12, %v2926_v10  ;;  %v2468_v24 = vsel %vm2463_vm5, %v2459_v61, %v2925_v27 }
 0x96e   : > { %v2656_v36 = vpack.c.bf16 %v2469_v54, %v2469_v54  ;;  %v2655_v11 = vpack.c.bf16 %v2468_v24, %v2468_v24 }
 0x96f   : > { %2511 = vst.msk [vmem:[%s4564_s25 + $0x18] sm:$0xf] %vm2504_vm6, %v2657_v53  ;;  %2512 = vst.msk [vmem:[%s4564_s25 + $0x1c] sm:$0xf] %vm2504_vm6, %v2658_v19 }
 0x970   : > { %2510 = vst.msk [vmem:[%s4564_s25 + $0x14] sm:$0xf] %vm2504_vm6, %v2656_v36  ;;  %2509 = vst.msk [vmem:[%s4564_s25 + $0x10] sm:$0xf] %vm2504_vm6, %v2655_v11 }
 0x971 PF: > { %s15_s18 = sadd.s32 1, %s3142_s18  }
 0x972   : > { %p12_p4 = scmp.ge.s32.totalorder %s15_s18, 4  }
 0x974   :  { %14 = sbr.rel (!%p12_p4) target bundleno = 1 (0x1), region = 71 }

</bundles_post_ra>
